<compile_context>
chip_gen: v7x
topology: tpu7x:2x2x1
jax: 0.10.0
libtpu: 0.0.40
codegen_flags: <defaults>
</compile_context>

<pallas_src>
import functools
import math

import jax
import jax.numpy as jnp
from jax.experimental import pallas as pl
from jax.experimental.pallas import tpu as pltpu

EPS = 1e-5  # nn.LayerNorm default


def _round_up(n, m):
    return ((n + m - 1) // m) * m


def transformer_block_kernel(
    x_ref, ctx_ref,
    g1_ref, b1_ref, wqs_ref, wks_ref, wvs_ref,
    g2_ref, b2_ref, wqc_ref, wkc_ref, wvc_ref,
    g3_ref, b3_ref, w1_ref, bf1_ref, w2_ref, bf2_ref,
    o_ref,
    *, B, T, S, H, mm_dtype,
):
    x = x_ref[...]       # (B*T, Hp) f32, zero-padded in lanes >= H
    ctx = ctx_ref[...]   # (B*S, Cp) f32, zero-padded in lanes >= C
    Hp = x.shape[-1]
    scale = 1.0 / math.sqrt(H)        # embed_dim == hidden_dim in both attns
    inv_h = 1.0 / H

    # lane-validity mask for LayerNorm statistics over the real H features
    valid = jax.lax.broadcasted_iota(jnp.int32, x.shape, 1) < H

    def layernorm(v, g, b):
        mu = jnp.sum(v, axis=-1, keepdims=True) * inv_h
        vc = jnp.where(valid, v - mu, 0.0)
        var = jnp.sum(vc * vc, axis=-1, keepdims=True) * inv_h
        # gamma / beta are zero-padded, so padded lanes stay exactly 0.
        return vc * jax.lax.rsqrt(var + EPS) * g + b

    def attention(q_in, kv_in, wq, wk, wv, s_len):
        # Projections (f32 accumulation); fold the softmax scale into Q.
        q = jnp.dot(q_in.astype(mm_dtype), wq,
                    preferred_element_type=jnp.float32) * scale
        k = jnp.dot(kv_in.astype(mm_dtype), wk,
                    preferred_element_type=jnp.float32)
        v = jnp.dot(kv_in.astype(mm_dtype), wv,
                    preferred_element_type=jnp.float32)
        qb = q.reshape(B, T, q.shape[-1]).astype(mm_dtype)
        kb = k.reshape(B, s_len, k.shape[-1]).astype(mm_dtype)
        vb = v.reshape(B, s_len, v.shape[-1]).astype(mm_dtype)
        # scores: contract last dims directly (no k.T / XLU transpose)
        s = jax.lax.dot_general(
            qb, kb, (((2,), (2,)), ((0,), (0,))),
            preferred_element_type=jnp.float32)            # (B, T, S)
        s = s - jnp.max(s, axis=-1, keepdims=True)
        p = jnp.exp(s)
        p = p * pl.reciprocal(jnp.sum(p, axis=-1, keepdims=True), approx=True)
        o = jax.lax.dot_general(
            p.astype(mm_dtype), vb, (((2,), (1,)), ((0,), (0,))),
            preferred_element_type=jnp.float32)            # (B, T, Hp)
        return o.reshape(B * T, Hp)

    # --- self attention block: x = attn_self(norm1(x)) + x
    h = layernorm(x, g1_ref[...], b1_ref[...])
    x = attention(h, h, wqs_ref[...], wks_ref[...], wvs_ref[...], T) + x

    # --- cross attention block: x = attn_cross(norm2(x), context) + x
    h = layernorm(x, g2_ref[...], b2_ref[...])
    x = attention(h, ctx, wqc_ref[...], wkc_ref[...], wvc_ref[...], S) + x

    # --- FFN block: x = ffn(norm3(x)) + x   (exact erf GELU, as in torch)
    h = layernorm(x, g3_ref[...], b3_ref[...])
    f = jnp.dot(h.astype(mm_dtype), w1_ref[...],
                preferred_element_type=jnp.float32) + bf1_ref[...]
    f = 0.5 * f * (1.0 + jax.lax.erf(f * (1.0 / math.sqrt(2.0))))
    f = jnp.dot(f.astype(mm_dtype), w2_ref[...],
                preferred_element_type=jnp.float32) + bf2_ref[...]
    o_ref[...] = x + f


def transformer_block(x, context, params, *, matmul_dtype=jnp.float32):
    """params: 16 unpadded arrays (weights pre-transposed to (in, out),
    LayerNorm/bias params as (1, features))."""
    B, T, H = x.shape
    _, S, C = context.shape
    LANE = 128
    Hp, Cp, Fp = _round_up(H, LANE), _round_up(C, LANE), _round_up(3 * H, LANE)

    def pad2(a, rows, cols, dtype):
        return jnp.pad(
            a, ((0, rows - a.shape[0]), (0, cols - a.shape[1]))).astype(dtype)

    (g1, b1, wqs, wks, wvs, g2, b2, wqc, wkc, wvc,
     g3, b3, w1, bf1, w2, bf2) = params
    wd = matmul_dtype  # weights fed to the MXU; vectors stay f32
    padded = [
        pad2(g1, 1, Hp, jnp.float32), pad2(b1, 1, Hp, jnp.float32),
        pad2(wqs, Hp, Hp, wd), pad2(wks, Hp, Hp, wd), pad2(wvs, Hp, Hp, wd),
        pad2(g2, 1, Hp, jnp.float32), pad2(b2, 1, Hp, jnp.float32),
        pad2(wqc, Hp, Hp, wd), pad2(wkc, Cp, Hp, wd), pad2(wvc, Cp, Hp, wd),
        pad2(g3, 1, Hp, jnp.float32), pad2(b3, 1, Hp, jnp.float32),
        pad2(w1, Hp, Fp, wd), pad2(bf1, 1, Fp, jnp.float32),
        pad2(w2, Fp, Hp, wd), pad2(bf2, 1, Hp, jnp.float32),
    ]

    # Lane-dense, flattened token / context slabs (zero-padded feature dims).
    x2d = jnp.pad(x.reshape(B * T, H).astype(jnp.float32),
                  ((0, 0), (0, Hp - H)))
    c2d = jnp.pad(context.reshape(B * S, C).astype(jnp.float32),
                  ((0, 0), (0, Cp - C)))

    kernel = functools.partial(
        transformer_block_kernel, B=B, T=T, S=S, H=H, mm_dtype=wd)

    # Single grid step: whole problem resident in VMEM (single-buffered).
    out2d = pl.pallas_call(
        kernel,
        out_shape=jax.ShapeDtypeStruct((B * T, Hp), jnp.float32),
    )(x2d, c2d, *padded)

    return out2d[:, :H].reshape(B, T, H)


def reference_block(x, context, params):
    (g1, b1, wqs, wks, wvs, g2, b2, wqc, wkc, wvc,
     g3, b3, w1, bf1, w2, bf2) = params

    def ln(v, g, b):
        mu = jnp.mean(v, axis=-1, keepdims=True)
        var = jnp.mean((v - mu) ** 2, axis=-1, keepdims=True)
        return (v - mu) * jax.lax.rsqrt(var + EPS) * g + b

    def attn(q_in, kv_in, wq, wk, wv):
        Q = q_in @ wq
        K = kv_in @ wk
        V = kv_in @ wv
        s = jnp.einsum("bth,bsh->bts", Q, K) / math.sqrt(Q.shape[-1])
        p = jax.nn.softmax(s, axis=-1)
        return jnp.einsum("bts,bsh->bth", p, V)

    h = ln(x, g1, b1)
    x = attn(h, h, wqs, wks, wvs) + x
    h = ln(x, g2, b2)
    x = attn(h, context, wqc, wkc, wvc) + x
    h = ln(x, g3, b3)
    f = h @ w1 + bf1
    f = 0.5 * f * (1.0 + jax.lax.erf(f / math.sqrt(2.0)))
    f = f @ w2 + bf2
    return x + f


if __name__ == "__main__":
    B, T, H = 2, 8, 32      # batch, token seq, hidden_dim (== embed_dim)
    S, C = 8, 16            # context seq, context_dim

    key = jax.random.PRNGKey(0)
    keys = jax.random.split(key, 16)

    def w(k, shape, scale=0.05):
        return (scale * jax.random.normal(k, shape)).astype(jnp.float32)

    params = [
        jnp.ones((1, H), jnp.float32),          # norm1 gamma
        jnp.zeros((1, H), jnp.float32),         # norm1 beta
        w(keys[0], (H, H)),                     # self-attn Wq  (in, out)
        w(keys[1], (H, H)),                     # self-attn Wk
        w(keys[2], (H, H)),                     # self-attn Wv
        jnp.ones((1, H), jnp.float32),          # norm2 gamma
        jnp.zeros((1, H), jnp.float32),         # norm2 beta
        w(keys[3], (H, H)),                     # cross-attn Wq
        w(keys[4], (C, H)),                     # cross-attn Wk
        w(keys[5], (C, H)),                     # cross-attn Wv
        jnp.ones((1, H), jnp.float32),          # norm3 gamma
        jnp.zeros((1, H), jnp.float32),         # norm3 beta
        w(keys[6], (H, 3 * H)),                 # ffn W1
        w(keys[7], (1, 3 * H)),                 # ffn b1
        w(keys[8], (3 * H, H)),                 # ffn W2
        w(keys[9], (1, H)),                     # ffn b2
    ]

    x = jax.random.normal(keys[10], (B, T, H), jnp.float32)
    context = jax.random.normal(keys[11], (B, S, C), jnp.float32)

    ref = reference_block(x, context, params)

    # f32 matmuls: tight check of the kernel algorithm.
    out_f32 = jax.block_until_ready(
        transformer_block(x, context, params, matmul_dtype=jnp.float32))
    assert out_f32.shape == (B, T, H)
    err_f32 = float(jnp.max(jnp.abs(out_f32 - ref)))
    assert err_f32 < 5e-3, err_f32   # slack for approx (EUP) reciprocal

    # bf16 MXU operands with f32 accumulation: the recommended perf config.
    out_bf16 = jax.block_until_ready(
        transformer_block(x, context, params, matmul_dtype=jnp.bfloat16))
    err_bf16 = float(jnp.max(jnp.abs(out_bf16 - ref)))
    assert err_bf16 < 5e-2, err_bf16

    print("KERNEL_OK")
</pallas_src>

<mosaic_0001>
module attributes {stable_mosaic.version = 11 : i64} {
  func.func @transformer_block_kernel(%arg0: memref<16x128xf32, #tpu.memory_space<vmem>>, %arg1: memref<16x128xf32, #tpu.memory_space<vmem>>, %arg2: memref<1x128xf32, #tpu.memory_space<vmem>>, %arg3: memref<1x128xf32, #tpu.memory_space<vmem>>, %arg4: memref<128x128xf32, #tpu.memory_space<vmem>>, %arg5: memref<128x128xf32, #tpu.memory_space<vmem>>, %arg6: memref<128x128xf32, #tpu.memory_space<vmem>>, %arg7: memref<1x128xf32, #tpu.memory_space<vmem>>, %arg8: memref<1x128xf32, #tpu.memory_space<vmem>>, %arg9: memref<128x128xf32, #tpu.memory_space<vmem>>, %arg10: memref<128x128xf32, #tpu.memory_space<vmem>>, %arg11: memref<128x128xf32, #tpu.memory_space<vmem>>, %arg12: memref<1x128xf32, #tpu.memory_space<vmem>>, %arg13: memref<1x128xf32, #tpu.memory_space<vmem>>, %arg14: memref<128x128xf32, #tpu.memory_space<vmem>>, %arg15: memref<1x128xf32, #tpu.memory_space<vmem>>, %arg16: memref<128x128xf32, #tpu.memory_space<vmem>>, %arg17: memref<1x128xf32, #tpu.memory_space<vmem>>, %arg18: memref<16x128xf32, #tpu.memory_space<vmem>>) attributes {dimension_semantics = [], scalar_prefetch = 0 : i64, scratch_operands = 0 : i64, tpu.core_type = #tpu.core_type<tc>} {
    %c0 = arith.constant 0 : index
    %c0_0 = arith.constant 0 : index
    %0 = vector.load %arg0[%c0, %c0_0] : memref<16x128xf32, #tpu.memory_space<vmem>>, vector<16x128xf32>
    %c0_1 = arith.constant 0 : index
    %c0_2 = arith.constant 0 : index
    %1 = vector.load %arg1[%c0_1, %c0_2] : memref<16x128xf32, #tpu.memory_space<vmem>>, vector<16x128xf32>
    %2 = tpu.iota {dimensions = array<i32: 1>} : vector<16x128xi32>
    %c32_i32 = arith.constant 32 : i32
    %3 = vector.broadcast %c32_i32 : i32 to vector<16x128xi32>
    %4 = arith.cmpi slt, %2, %3 : vector<16x128xi32>
    %c0_3 = arith.constant 0 : index
    %c0_4 = arith.constant 0 : index
    %5 = vector.load %arg2[%c0_3, %c0_4] : memref<1x128xf32, #tpu.memory_space<vmem>>, vector<1x128xf32>
    %c0_5 = arith.constant 0 : index
    %c0_6 = arith.constant 0 : index
    %6 = vector.load %arg3[%c0_5, %c0_6] : memref<1x128xf32, #tpu.memory_space<vmem>>, vector<1x128xf32>
    %cst = arith.constant dense<0.000000e+00> : vector<16xf32>
    %7 = vector.multi_reduction <add>, %0, %cst [1] : vector<16x128xf32> to vector<16xf32>
    %8 = vector.shape_cast %7 : vector<16xf32> to vector<16x1xf32>
    %cst_7 = arith.constant 3.125000e-02 : f32
    %9 = vector.broadcast %cst_7 : f32 to vector<16x1xf32>
    %10 = arith.mulf %8, %9 : vector<16x1xf32>
    %11 = vector.broadcast %10 : vector<16x1xf32> to vector<16x128xf32>
    %12 = arith.subf %0, %11 : vector<16x128xf32>
    %cst_8 = arith.constant 0.000000e+00 : f32
    %13 = vector.broadcast %cst_8 : f32 to vector<16x128xf32>
    %14 = arith.select %4, %12, %13 : vector<16x128xi1>, vector<16x128xf32>
    %15 = arith.mulf %14, %14 : vector<16x128xf32>
    %cst_9 = arith.constant dense<0.000000e+00> : vector<16xf32>
    %16 = vector.multi_reduction <add>, %15, %cst_9 [1] : vector<16x128xf32> to vector<16xf32>
    %17 = vector.shape_cast %16 : vector<16xf32> to vector<16x1xf32>
    %cst_10 = arith.constant 3.125000e-02 : f32
    %18 = vector.broadcast %cst_10 : f32 to vector<16x1xf32>
    %19 = arith.mulf %17, %18 : vector<16x1xf32>
    %cst_11 = arith.constant 9.99999974E-6 : f32
    %20 = vector.broadcast %cst_11 : f32 to vector<16x1xf32>
    %21 = arith.addf %19, %20 : vector<16x1xf32>
    %22 = math.rsqrt %21 : vector<16x1xf32>
    %23 = vector.broadcast %22 : vector<16x1xf32> to vector<16x128xf32>
    %24 = arith.mulf %14, %23 : vector<16x128xf32>
    %25 = vector.broadcast %5 : vector<1x128xf32> to vector<16x128xf32>
    %26 = arith.mulf %24, %25 : vector<16x128xf32>
    %27 = vector.broadcast %6 : vector<1x128xf32> to vector<16x128xf32>
    %28 = arith.addf %26, %27 : vector<16x128xf32>
    %c0_12 = arith.constant 0 : index
    %c0_13 = arith.constant 0 : index
    %29 = vector.load %arg4[%c0_12, %c0_13] : memref<128x128xf32, #tpu.memory_space<vmem>>, vector<128x128xf32>
    %c0_14 = arith.constant 0 : index
    %c0_15 = arith.constant 0 : index
    %30 = vector.load %arg5[%c0_14, %c0_15] : memref<128x128xf32, #tpu.memory_space<vmem>>, vector<128x128xf32>
    %c0_16 = arith.constant 0 : index
    %c0_17 = arith.constant 0 : index
    %31 = vector.load %arg6[%c0_16, %c0_17] : memref<128x128xf32, #tpu.memory_space<vmem>>, vector<128x128xf32>
    %cst_18 = arith.constant dense<0.000000e+00> : vector<16x128xf32>
    %32 = tpu.matmul %28, %29, %cst_18 {dimension_numbers = #tpu.dot_dimension_numbers<[1], [0], [0], [1], [0, 0, 1, 1], [], []>} : vector<16x128xf32>, vector<128x128xf32>, vector<16x128xf32> -> vector<16x128xf32>
    %cst_19 = arith.constant 0.176776692 : f32
    %33 = vector.broadcast %cst_19 : f32 to vector<16x128xf32>
    %34 = arith.mulf %32, %33 : vector<16x128xf32>
    %cst_20 = arith.constant dense<0.000000e+00> : vector<16x128xf32>
    %35 = tpu.matmul %28, %30, %cst_20 {dimension_numbers = #tpu.dot_dimension_numbers<[1], [0], [0], [1], [0, 0, 1, 1], [], []>} : vector<16x128xf32>, vector<128x128xf32>, vector<16x128xf32> -> vector<16x128xf32>
    %cst_21 = arith.constant dense<0.000000e+00> : vector<16x128xf32>
    %36 = tpu.matmul %28, %31, %cst_21 {dimension_numbers = #tpu.dot_dimension_numbers<[1], [0], [0], [1], [0, 0, 1, 1], [], []>} : vector<16x128xf32>, vector<128x128xf32>, vector<16x128xf32> -> vector<16x128xf32>
    %37 = vector.shape_cast %34 : vector<16x128xf32> to vector<2x8x128xf32>
    %38 = vector.shape_cast %35 : vector<16x128xf32> to vector<2x8x128xf32>
    %39 = vector.shape_cast %36 : vector<16x128xf32> to vector<2x8x128xf32>
    %cst_22 = arith.constant dense<0.000000e+00> : vector<2x8x8xf32>
    %40 = tpu.matmul %37, %38, %cst_22 {dimension_numbers = #tpu.dot_dimension_numbers<[2], [2], [1], [1], [0, 0, 0, 1, 1, 1], [0], [0]>} : vector<2x8x128xf32>, vector<2x8x128xf32>, vector<2x8x8xf32> -> vector<2x8x8xf32>
    %cst_23 = arith.constant dense<0xFF800000> : vector<2x8xf32>
    %41 = vector.multi_reduction <maximumf>, %40, %cst_23 [2] : vector<2x8x8xf32> to vector<2x8xf32>
    %42 = vector.shape_cast %41 : vector<2x8xf32> to vector<2x8x1xf32>
    %43 = vector.broadcast %42 : vector<2x8x1xf32> to vector<2x8x8xf32>
    %44 = arith.subf %40, %43 : vector<2x8x8xf32>
    %45 = math.exp %44 : vector<2x8x8xf32>
    %cst_24 = arith.constant dense<0.000000e+00> : vector<2x8xf32>
    %46 = vector.multi_reduction <add>, %45, %cst_24 [2] : vector<2x8x8xf32> to vector<2x8xf32>
    %47 = vector.shape_cast %46 : vector<2x8xf32> to vector<2x8x1xf32>
    %48 = tpu.reciprocal %47 {approx = true} : vector<2x8x1xf32> -> vector<2x8x1xf32>
    %49 = vector.broadcast %48 : vector<2x8x1xf32> to vector<2x8x8xf32>
    %50 = arith.mulf %45, %49 : vector<2x8x8xf32>
    %cst_25 = arith.constant dense<0.000000e+00> : vector<2x8x128xf32>
    %51 = tpu.matmul %50, %39, %cst_25 {dimension_numbers = #tpu.dot_dimension_numbers<[2], [1], [1], [2], [0, 0, 0, 1, 1, 2], [0], [0]>} : vector<2x8x8xf32>, vector<2x8x128xf32>, vector<2x8x128xf32> -> vector<2x8x128xf32>
    %52 = vector.shape_cast %51 : vector<2x8x128xf32> to vector<16x128xf32>
    %53 = arith.addf %52, %0 : vector<16x128xf32>
    %c0_26 = arith.constant 0 : index
    %c0_27 = arith.constant 0 : index
    %54 = vector.load %arg7[%c0_26, %c0_27] : memref<1x128xf32, #tpu.memory_space<vmem>>, vector<1x128xf32>
    %c0_28 = arith.constant 0 : index
    %c0_29 = arith.constant 0 : index
    %55 = vector.load %arg8[%c0_28, %c0_29] : memref<1x128xf32, #tpu.memory_space<vmem>>, vector<1x128xf32>
    %cst_30 = arith.constant dense<0.000000e+00> : vector<16xf32>
    %56 = vector.multi_reduction <add>, %53, %cst_30 [1] : vector<16x128xf32> to vector<16xf32>
    %57 = vector.shape_cast %56 : vector<16xf32> to vector<16x1xf32>
    %cst_31 = arith.constant 3.125000e-02 : f32
    %58 = vector.broadcast %cst_31 : f32 to vector<16x1xf32>
    %59 = arith.mulf %57, %58 : vector<16x1xf32>
    %60 = vector.broadcast %59 : vector<16x1xf32> to vector<16x128xf32>
    %61 = arith.subf %53, %60 : vector<16x128xf32>
    %cst_32 = arith.constant 0.000000e+00 : f32
    %62 = vector.broadcast %cst_32 : f32 to vector<16x128xf32>
    %63 = arith.select %4, %61, %62 : vector<16x128xi1>, vector<16x128xf32>
    %64 = arith.mulf %63, %63 : vector<16x128xf32>
    %cst_33 = arith.constant dense<0.000000e+00> : vector<16xf32>
    %65 = vector.multi_reduction <add>, %64, %cst_33 [1] : vector<16x128xf32> to vector<16xf32>
    %66 = vector.shape_cast %65 : vector<16xf32> to vector<16x1xf32>
    %cst_34 = arith.constant 3.125000e-02 : f32
    %67 = vector.broadcast %cst_34 : f32 to vector<16x1xf32>
    %68 = arith.mulf %66, %67 : vector<16x1xf32>
    %cst_35 = arith.constant 9.99999974E-6 : f32
    %69 = vector.broadcast %cst_35 : f32 to vector<16x1xf32>
    %70 = arith.addf %68, %69 : vector<16x1xf32>
    %71 = math.rsqrt %70 : vector<16x1xf32>
    %72 = vector.broadcast %71 : vector<16x1xf32> to vector<16x128xf32>
    %73 = arith.mulf %63, %72 : vector<16x128xf32>
    %74 = vector.broadcast %54 : vector<1x128xf32> to vector<16x128xf32>
    %75 = arith.mulf %73, %74 : vector<16x128xf32>
    %76 = vector.broadcast %55 : vector<1x128xf32> to vector<16x128xf32>
    %77 = arith.addf %75, %76 : vector<16x128xf32>
    %c0_36 = arith.constant 0 : index
    %c0_37 = arith.constant 0 : index
    %78 = vector.load %arg9[%c0_36, %c0_37] : memref<128x128xf32, #tpu.memory_space<vmem>>, vector<128x128xf32>
    %c0_38 = arith.constant 0 : index
    %c0_39 = arith.constant 0 : index
    %79 = vector.load %arg10[%c0_38, %c0_39] : memref<128x128xf32, #tpu.memory_space<vmem>>, vector<128x128xf32>
    %c0_40 = arith.constant 0 : index
    %c0_41 = arith.constant 0 : index
    %80 = vector.load %arg11[%c0_40, %c0_41] : memref<128x128xf32, #tpu.memory_space<vmem>>, vector<128x128xf32>
    %cst_42 = arith.constant dense<0.000000e+00> : vector<16x128xf32>
    %81 = tpu.matmul %77, %78, %cst_42 {dimension_numbers = #tpu.dot_dimension_numbers<[1], [0], [0], [1], [0, 0, 1, 1], [], []>} : vector<16x128xf32>, vector<128x128xf32>, vector<16x128xf32> -> vector<16x128xf32>
    %cst_43 = arith.constant 0.176776692 : f32
    %82 = vector.broadcast %cst_43 : f32 to vector<16x128xf32>
    %83 = arith.mulf %81, %82 : vector<16x128xf32>
    %cst_44 = arith.constant dense<0.000000e+00> : vector<16x128xf32>
    %84 = tpu.matmul %1, %79, %cst_44 {dimension_numbers = #tpu.dot_dimension_numbers<[1], [0], [0], [1], [0, 0, 1, 1], [], []>} : vector<16x128xf32>, vector<128x128xf32>, vector<16x128xf32> -> vector<16x128xf32>
    %cst_45 = arith.constant dense<0.000000e+00> : vector<16x128xf32>
    %85 = tpu.matmul %1, %80, %cst_45 {dimension_numbers = #tpu.dot_dimension_numbers<[1], [0], [0], [1], [0, 0, 1, 1], [], []>} : vector<16x128xf32>, vector<128x128xf32>, vector<16x128xf32> -> vector<16x128xf32>
    %86 = vector.shape_cast %83 : vector<16x128xf32> to vector<2x8x128xf32>
    %87 = vector.shape_cast %84 : vector<16x128xf32> to vector<2x8x128xf32>
    %88 = vector.shape_cast %85 : vector<16x128xf32> to vector<2x8x128xf32>
    %cst_46 = arith.constant dense<0.000000e+00> : vector<2x8x8xf32>
    %89 = tpu.matmul %86, %87, %cst_46 {dimension_numbers = #tpu.dot_dimension_numbers<[2], [2], [1], [1], [0, 0, 0, 1, 1, 1], [0], [0]>} : vector<2x8x128xf32>, vector<2x8x128xf32>, vector<2x8x8xf32> -> vector<2x8x8xf32>
    %cst_47 = arith.constant dense<0xFF800000> : vector<2x8xf32>
    %90 = vector.multi_reduction <maximumf>, %89, %cst_47 [2] : vector<2x8x8xf32> to vector<2x8xf32>
    %91 = vector.shape_cast %90 : vector<2x8xf32> to vector<2x8x1xf32>
    %92 = vector.broadcast %91 : vector<2x8x1xf32> to vector<2x8x8xf32>
    %93 = arith.subf %89, %92 : vector<2x8x8xf32>
    %94 = math.exp %93 : vector<2x8x8xf32>
    %cst_48 = arith.constant dense<0.000000e+00> : vector<2x8xf32>
    %95 = vector.multi_reduction <add>, %94, %cst_48 [2] : vector<2x8x8xf32> to vector<2x8xf32>
    %96 = vector.shape_cast %95 : vector<2x8xf32> to vector<2x8x1xf32>
    %97 = tpu.reciprocal %96 {approx = true} : vector<2x8x1xf32> -> vector<2x8x1xf32>
    %98 = vector.broadcast %97 : vector<2x8x1xf32> to vector<2x8x8xf32>
    %99 = arith.mulf %94, %98 : vector<2x8x8xf32>
    %cst_49 = arith.constant dense<0.000000e+00> : vector<2x8x128xf32>
    %100 = tpu.matmul %99, %88, %cst_49 {dimension_numbers = #tpu.dot_dimension_numbers<[2], [1], [1], [2], [0, 0, 0, 1, 1, 2], [0], [0]>} : vector<2x8x8xf32>, vector<2x8x128xf32>, vector<2x8x128xf32> -> vector<2x8x128xf32>
    %101 = vector.shape_cast %100 : vector<2x8x128xf32> to vector<16x128xf32>
    %102 = arith.addf %101, %53 : vector<16x128xf32>
    %c0_50 = arith.constant 0 : index
    %c0_51 = arith.constant 0 : index
    %103 = vector.load %arg12[%c0_50, %c0_51] : memref<1x128xf32, #tpu.memory_space<vmem>>, vector<1x128xf32>
    %c0_52 = arith.constant 0 : index
    %c0_53 = arith.constant 0 : index
    %104 = vector.load %arg13[%c0_52, %c0_53] : memref<1x128xf32, #tpu.memory_space<vmem>>, vector<1x128xf32>
    %cst_54 = arith.constant dense<0.000000e+00> : vector<16xf32>
    %105 = vector.multi_reduction <add>, %102, %cst_54 [1] : vector<16x128xf32> to vector<16xf32>
    %106 = vector.shape_cast %105 : vector<16xf32> to vector<16x1xf32>
    %cst_55 = arith.constant 3.125000e-02 : f32
    %107 = vector.broadcast %cst_55 : f32 to vector<16x1xf32>
    %108 = arith.mulf %106, %107 : vector<16x1xf32>
    %109 = vector.broadcast %108 : vector<16x1xf32> to vector<16x128xf32>
    %110 = arith.subf %102, %109 : vector<16x128xf32>
    %cst_56 = arith.constant 0.000000e+00 : f32
    %111 = vector.broadcast %cst_56 : f32 to vector<16x128xf32>
    %112 = arith.select %4, %110, %111 : vector<16x128xi1>, vector<16x128xf32>
    %113 = arith.mulf %112, %112 : vector<16x128xf32>
    %cst_57 = arith.constant dense<0.000000e+00> : vector<16xf32>
    %114 = vector.multi_reduction <add>, %113, %cst_57 [1] : vector<16x128xf32> to vector<16xf32>
    %115 = vector.shape_cast %114 : vector<16xf32> to vector<16x1xf32>
    %cst_58 = arith.constant 3.125000e-02 : f32
    %116 = vector.broadcast %cst_58 : f32 to vector<16x1xf32>
    %117 = arith.mulf %115, %116 : vector<16x1xf32>
    %cst_59 = arith.constant 9.99999974E-6 : f32
    %118 = vector.broadcast %cst_59 : f32 to vector<16x1xf32>
    %119 = arith.addf %117, %118 : vector<16x1xf32>
    %120 = math.rsqrt %119 : vector<16x1xf32>
    %121 = vector.broadcast %120 : vector<16x1xf32> to vector<16x128xf32>
    %122 = arith.mulf %112, %121 : vector<16x128xf32>
    %123 = vector.broadcast %103 : vector<1x128xf32> to vector<16x128xf32>
    %124 = arith.mulf %122, %123 : vector<16x128xf32>
    %125 = vector.broadcast %104 : vector<1x128xf32> to vector<16x128xf32>
    %126 = arith.addf %124, %125 : vector<16x128xf32>
    %c0_60 = arith.constant 0 : index
    %c0_61 = arith.constant 0 : index
    %127 = vector.load %arg14[%c0_60, %c0_61] : memref<128x128xf32, #tpu.memory_space<vmem>>, vector<128x128xf32>
    %cst_62 = arith.constant dense<0.000000e+00> : vector<16x128xf32>
    %128 = tpu.matmul %126, %127, %cst_62 {dimension_numbers = #tpu.dot_dimension_numbers<[1], [0], [0], [1], [0, 0, 1, 1], [], []>} : vector<16x128xf32>, vector<128x128xf32>, vector<16x128xf32> -> vector<16x128xf32>
    %c0_63 = arith.constant 0 : index
    %c0_64 = arith.constant 0 : index
    %129 = vector.load %arg15[%c0_63, %c0_64] : memref<1x128xf32, #tpu.memory_space<vmem>>, vector<1x128xf32>
    %130 = vector.broadcast %129 : vector<1x128xf32> to vector<16x128xf32>
    %131 = arith.addf %128, %130 : vector<16x128xf32>
    %cst_65 = arith.constant 5.000000e-01 : f32
    %132 = vector.broadcast %cst_65 : f32 to vector<16x128xf32>
    %133 = arith.mulf %132, %131 : vector<16x128xf32>
    %cst_66 = arith.constant 0.707106769 : f32
    %134 = vector.broadcast %cst_66 : f32 to vector<16x128xf32>
    %135 = arith.mulf %131, %134 : vector<16x128xf32>
    %136 = math.erf %135 : vector<16x128xf32>
    %cst_67 = arith.constant 1.000000e+00 : f32
    %137 = vector.broadcast %cst_67 : f32 to vector<16x128xf32>
    %138 = arith.addf %137, %136 : vector<16x128xf32>
    %139 = arith.mulf %133, %138 : vector<16x128xf32>
    %c0_68 = arith.constant 0 : index
    %c0_69 = arith.constant 0 : index
    %140 = vector.load %arg16[%c0_68, %c0_69] : memref<128x128xf32, #tpu.memory_space<vmem>>, vector<128x128xf32>
    %cst_70 = arith.constant dense<0.000000e+00> : vector<16x128xf32>
    %141 = tpu.matmul %139, %140, %cst_70 {dimension_numbers = #tpu.dot_dimension_numbers<[1], [0], [0], [1], [0, 0, 1, 1], [], []>} : vector<16x128xf32>, vector<128x128xf32>, vector<16x128xf32> -> vector<16x128xf32>
    %c0_71 = arith.constant 0 : index
    %c0_72 = arith.constant 0 : index
    %142 = vector.load %arg17[%c0_71, %c0_72] : memref<1x128xf32, #tpu.memory_space<vmem>>, vector<1x128xf32>
    %143 = vector.broadcast %142 : vector<1x128xf32> to vector<16x128xf32>
    %144 = arith.addf %141, %143 : vector<16x128xf32>
    %145 = arith.addf %102, %144 : vector<16x128xf32>
    %c0_73 = arith.constant 0 : index
    %c0_74 = arith.constant 0 : index
    %146 = vector.load %arg18[%c0_73, %c0_74] : memref<16x128xf32, #tpu.memory_space<vmem>>, vector<16x128xf32>
    tpu.vector_store %arg18[%c0_73, %c0_74], %145 {strides = array<i32>} : memref<16x128xf32, #tpu.memory_space<vmem>>, vector<16x128xf32>,
    return
  }
}

</mosaic_0001>

<bundles_post_ra>
// kernel: tpu_custom_call.1
= control target key start
LH: loop header
LB: loop body
LE: loop exit
PB: predicated region body
PF: predicated region fallthrough
CT: control target
= control target key end

     0   :  { %s3222_s0 = inlined_call_operand.hbm [shape: f32[16,128], index: 0, kind: input, shape index: {}]   ;;  %s3223_s1 = inlined_call_operand.hbm [shape: f32[16,128], index: 1, kind: input, shape index: {}]   ;;  %s3224_s2 = inlined_call_operand.vmem [shape: f32[1,128], index: 2, kind: input, shape index: {}]   ;;  %s3225_s3 = inlined_call_operand.vmem [shape: f32[1,128], index: 3, kind: input, shape index: {}]   ;;  %s3226_s4 = inlined_call_operand.hbm [shape: f32[128,128], index: 4, kind: input, shape index: {}]   ;;  %s3227_s5 = inlined_call_operand.hbm [shape: f32[128,128], index: 5, kind: input, shape index: {}]   ;;  %s3228_s6 = inlined_call_operand.hbm [shape: f32[128,128], index: 6, kind: input, shape index: {}]   ;;  %s3229_s7 = inlined_call_operand.vmem [shape: f32[1,128], index: 7, kind: input, shape index: {}]   ;;  %s3230_s8 = inlined_call_operand.vmem [shape: f32[1,128], index: 8, kind: input, shape index: {}]   ;;  %s3231_s9 = inlined_call_operand.hbm [shape: f32[128,128], index: 9, kind: input, shape index: {}]   ;;  %s3232_s10 = inlined_call_operand.hbm [shape: f32[128,128], index: 10, kind: input, shape index: {}]   ;;  %s3233_s11 = inlined_call_operand.hbm [shape: f32[128,128], index: 11, kind: input, shape index: {}]   ;;  %s3234_s12 = inlined_call_operand.vmem [shape: f32[1,128], index: 12, kind: input, shape index: {}]   ;;  %s3235_s13 = inlined_call_operand.vmem [shape: f32[1,128], index: 13, kind: input, shape index: {}]   ;;  %s3236_s14 = inlined_call_operand.hbm [shape: f32[128,128], index: 14, kind: input, shape index: {}]   ;;  %s3237_s15 = inlined_call_operand.vmem [shape: f32[1,128], index: 15, kind: input, shape index: {}]   ;;  %s3238_s16 = inlined_call_operand.hbm [shape: f32[128,128], index: 16, kind: input, shape index: {}]   ;;  %s3239_s17 = inlined_call_operand.vmem [shape: f32[1,128], index: 17, kind: input, shape index: {}]   ;;  %s3240_s18 = inlined_call_operand.hbm [shape: f32[16,128], index: 18, kind: output, shape index: {}]  }
   0x1   :  { %3244 = sst [smem:[#allocation27_spill]] %s3222_s0 }
   0x2   :  { %3245 = sst [smem:[#allocation28_spill]] %s3223_s1 }
   0x3   :  { %3246 = sst [smem:[#allocation29_spill]] %s3224_s2 }
   0x4   :  { %3247 = sst [smem:[#allocation30_spill]] %s3240_s18 }
   0x5   :  { %23 = vsyncpa [#allocation3], 0 }
   0x6   :  { %24 = vsyncpa [#allocation6], 0 }
   0x7   :  { %25 = vsyncpa [#allocation9], 0 }
   0x8   :  { %26 = vsyncpa [#allocation12], 0 }
   0x9   :  { %27 = vsyncpa [#allocation15], 0 }
   0xa   :  { %28 = vsyncpa [#allocation18], 0 }
   0xb   :  { %29 = vsyncpa [#allocation4], 0  ;;  %s2783_s27 = smov [#allocation5]   ;;  %s2784_s29 = smov [#allocation8]  }
   0xc   :  { %s47_s28 = sshll.u32 %s2783_s27, 4  ;;  %s75_s30 = sshll.u32 %s2784_s29, 4  ;;  %s48_s28 = int_to_ptr.vmem [resolvable:$true] %s47_s28  ;;  %s2893_s30 = int_to_ptr.vmem [resolvable:$true] %s75_s30 }
   0xd   :  { %s3248_s1 = sld [smem:[#allocation28_spill]] }
  0x13   :  { %s2527_s20 = scalar_lea.hbm %s3248_s1, 256 }
  0x14   :  { %p2528_p0 = scmp.ne.s32.totalorder %s3248_s1, %s2527_s20  ;;  %p2531_p1 = scmp.lt.u32.totalorder %s2527_s20, %s3248_s1 }
  0x16   :  { %p2533_p2 = pnand %p2531_p1, %p2528_p0 }
  0x18   :  { %2536 = shalt.err (!%p2533_p2)
}
  0x19   :  { %s2537_s24 = scalar_lea.vmem %s48_s28, 256  ;;  %p2542_p4 = scmp.lt.s32.totalorder %s48_s28, %s48_s28 }
  0x1a   :  { %p2538_p3 = scmp.ne.s32.totalorder %s48_s28, %s2537_s24  ;;  %p2543_p5 = scmp.lt.s32.totalorder %s2537_s24, %s2537_s24 }
  0x1c   :  { %p2544_p6 = por %p2543_p5, %p2542_p4 }
  0x1e   :  { %p2545_p7 = pnand %p2544_p6, %p2538_p3 }
  0x20   :  { %2548 = shalt.err (!%p2545_p7)
}
  0x21   :  { %s2785_s25 = smov 128   ;;  %s2786_s26 = smov 8  }
  0x22   :  { %53 = dma.hbm_to_vmem [thread:$0]  %s3248_s1, 256, %s48_s28, [#allocation6], %s2785_s25, %s2785_s25, %s2786_s26  }
  0x23   :  { %s2549_s20 = scalar_lea.hbm %s3227_s5, 2048 }
  0x24   :  { %p2550_p8 = scmp.ne.s32.totalorder %s3227_s5, %s2549_s20  ;;  %p2553_p9 = scmp.lt.u32.totalorder %s2549_s20, %s3227_s5 }
  0x26   :  { %p2555_p10 = pnand %p2553_p9, %p2550_p8 }
  0x28   :  { %2558 = shalt.err (!%p2555_p10)
}
  0x29   :  { %s2559_s24 = scalar_lea.vmem %s2893_s30, 2048  ;;  %p2564_p12 = scmp.lt.s32.totalorder %s2893_s30, %s2893_s30 }
  0x2a   :  { %p2560_p11 = scmp.ne.s32.totalorder %s2893_s30, %s2559_s24  ;;  %p2565_p13 = scmp.lt.s32.totalorder %s2559_s24, %s2559_s24 }
  0x2c   :  { %p2566_p0 = por %p2565_p13, %p2564_p12 }
  0x2e   :  { %p2567_p1 = pnand %p2566_p0, %p2560_p11 }
  0x30   :  { %2570 = shalt.err (!%p2567_p1)
}
  0x31   :  { %81 = dma.hbm_to_vmem [thread:$0]  %s3227_s5, 2048, %s2893_s30, [#allocation9], %s2785_s25, %s2785_s25, %s2786_s26  }
  0x32   :  { %s2787_s27 = smov [#allocation11]   ;;  %s2788_s0 = smov [#allocation14]  }
  0x33   :  { %s103_s29 = sshll.u32 %s2787_s27, 4  ;;  %s127_s19 = sshll.u32 %s2788_s0, 4  ;;  %s104_s29 = int_to_ptr.vmem [resolvable:$true] %s103_s29  ;;  %s2930_s19 = int_to_ptr.vmem [resolvable:$true] %s127_s19 }
  0x34   :  { %s2571_s22 = scalar_lea.hbm %s3231_s9, 2048 }
  0x35   :  { %p2572_p2 = scmp.ne.s32.totalorder %s3231_s9, %s2571_s22  ;;  %p2575_p3 = scmp.lt.u32.totalorder %s2571_s22, %s3231_s9 }
  0x37   :  { %p2577_p4 = pnand %p2575_p3, %p2572_p2 }
  0x39   :  { %2580 = shalt.err (!%p2577_p4)
}
  0x3a   :  { %s2581_s5 = scalar_lea.vmem %s104_s29, 2048  ;;  %p2586_p6 = scmp.lt.s32.totalorder %s104_s29, %s104_s29 }
  0x3b   :  { %p2582_p5 = scmp.ne.s32.totalorder %s104_s29, %s2581_s5  ;;  %p2587_p7 = scmp.lt.s32.totalorder %s2581_s5, %s2581_s5 }
  0x3d   :  { %p2588_p8 = por %p2587_p7, %p2586_p6 }
  0x3f   :  { %p2589_p9 = pnand %p2588_p8, %p2582_p5 }
  0x41   :  { %2592 = shalt.err (!%p2589_p9)
}
  0x42   :  { %109 = dma.hbm_to_vmem [thread:$0]  %s3231_s9, 2048, %s104_s29, [#allocation12], %s2785_s25, %s2785_s25, %s2786_s26  }
  0x43   :  { %s2593_s18 = scalar_lea.hbm %s3233_s11, 2048 }
  0x44   :  { %p2594_p10 = scmp.ne.s32.totalorder %s3233_s11, %s2593_s18  ;;  %p2597_p11 = scmp.lt.u32.totalorder %s2593_s18, %s3233_s11 }
  0x46   :  { %p2599_p12 = pnand %p2597_p11, %p2594_p10 }
  0x48   :  { %2602 = shalt.err (!%p2599_p12)
}
  0x49   :  { %s2603_s2 = scalar_lea.vmem %s2930_s19, 2048  ;;  %p2608_p0 = scmp.lt.s32.totalorder %s2930_s19, %s2930_s19 }
  0x4a   :  { %p2604_p13 = scmp.ne.s32.totalorder %s2930_s19, %s2603_s2  ;;  %p2609_p1 = scmp.lt.s32.totalorder %s2603_s2, %s2603_s2 }
  0x4c   :  { %p2610_p2 = por %p2609_p1, %p2608_p0 }
  0x4e   :  { %p2611_p3 = pnand %p2610_p2, %p2604_p13 }
  0x50   :  { %2614 = shalt.err (!%p2611_p3)
}
  0x51   :  { %133 = dma.hbm_to_vmem [thread:$0]  %s3233_s11, 2048, %s2930_s19, [#allocation15], %s2785_s25, %s2785_s25, %s2786_s26  }
  0x52   :  { %s2789_s23 = smov [#allocation2]   ;;  %s2790_s5 = smov [#allocation7]  }
  0x53   :  { %s35_s24 = sshll.u32 %s2789_s23, 4  ;;  %s63_s30 = sshll.u32 %s2790_s5, 4  ;;  %s36_s24 = int_to_ptr.vmem [resolvable:$true] %s35_s24  ;;  %s2967_s30 = int_to_ptr.vmem [resolvable:$true] %s63_s30 }
  0x54   :  { %s3249_s27 = sld [smem:[#allocation27_spill]] }
  0x5a   :  { %s2615_s18 = scalar_lea.hbm %s3249_s27, 256 }
  0x5b   :  { %p2616_p4 = scmp.ne.s32.totalorder %s3249_s27, %s2615_s18  ;;  %p2619_p5 = scmp.lt.u32.totalorder %s2615_s18, %s3249_s27 }
  0x5d   :  { %p2621_p6 = pnand %p2619_p5, %p2616_p4 }
  0x5f   :  { %2624 = shalt.err (!%p2621_p6)
}
  0x60   :  { %s2625_s11 = scalar_lea.vmem %s36_s24, 256  ;;  %p2630_p8 = scmp.lt.s32.totalorder %s36_s24, %s36_s24 }
  0x61   :  { %p2626_p7 = scmp.ne.s32.totalorder %s36_s24, %s2625_s11  ;;  %p2631_p9 = scmp.lt.s32.totalorder %s2625_s11, %s2625_s11 }
  0x63   :  { %p2632_p10 = por %p2631_p9, %p2630_p8 }
  0x65   :  { %p2633_p11 = pnand %p2632_p10, %p2626_p7 }
  0x67   :  { %2636 = shalt.err (!%p2633_p11)
}
  0x68   :  { %41 = dma.hbm_to_vmem [thread:$0]  %s3249_s27, 256, %s36_s24, [#allocation3], %s2785_s25, %s2785_s25, %s2786_s26  }
  0x69   :  { %s2637_s23 = scalar_lea.hbm %s3226_s4, 2048 }
  0x6a   :  { %p2638_p12 = scmp.ne.s32.totalorder %s3226_s4, %s2637_s23  ;;  %p2641_p13 = scmp.lt.u32.totalorder %s2637_s23, %s3226_s4 }
  0x6c   :  { %p2643_p0 = pnand %p2641_p13, %p2638_p12 }
  0x6e   :  { %2646 = shalt.err (!%p2643_p0)
}
  0x6f   :  { %s2647_s0 = scalar_lea.vmem %s2967_s30, 2048  ;;  %p2652_p2 = scmp.lt.s32.totalorder %s2967_s30, %s2967_s30 }
  0x70   :  { %p2648_p1 = scmp.ne.s32.totalorder %s2967_s30, %s2647_s0  ;;  %p2653_p3 = scmp.lt.s32.totalorder %s2647_s0, %s2647_s0 }
  0x72   :  { %p2654_p4 = por %p2653_p3, %p2652_p2 }
  0x74   :  { %p2655_p5 = pnand %p2654_p4, %p2648_p1 }
  0x76   :  { %2658 = shalt.err (!%p2655_p5)
}
  0x77   :  { %69 = dma.hbm_to_vmem [thread:$0]  %s3226_s4, 2048, %s2967_s30, [#allocation6], %s2785_s25, %s2785_s25, %s2786_s26  }
  0x78   :  { %s2791_s20 = smov [#allocation10]   ;;  %s2792_s22 = smov [#allocation13]  }
  0x79   :  { %s87_s21 = sshll.u32 %s2791_s20, 4  ;;  %s115_s11 = sshll.u32 %s2792_s22, 4  ;;  %s88_s21 = int_to_ptr.vmem [resolvable:$true] %s87_s21  ;;  %s3004_s11 = int_to_ptr.vmem [resolvable:$true] %s115_s11 }
  0x7a   :  { %s2659_s9 = scalar_lea.hbm %s3228_s6, 2048 }
  0x7b   :  { %p2660_p6 = scmp.ne.s32.totalorder %s3228_s6, %s2659_s9  ;;  %p2663_p7 = scmp.lt.u32.totalorder %s2659_s9, %s3228_s6 }
  0x7d   :  { %p2665_p8 = pnand %p2663_p7, %p2660_p6 }
  0x7f   :  { %2668 = shalt.err (!%p2665_p8)
}
  0x80   :  { %s2669_s4 = scalar_lea.vmem %s88_s21, 2048  ;;  %p2674_p10 = scmp.lt.s32.totalorder %s88_s21, %s88_s21 }
  0x81   :  { %p2670_p9 = scmp.ne.s32.totalorder %s88_s21, %s2669_s4  ;;  %p2675_p11 = scmp.lt.s32.totalorder %s2669_s4, %s2669_s4 }
  0x83   :  { %p2676_p12 = por %p2675_p11, %p2674_p10 }
  0x85   :  { %p2677_p13 = pnand %p2676_p12, %p2670_p9 }
  0x87   :  { %2680 = shalt.err (!%p2677_p13)
}
  0x88   :  { %93 = dma.hbm_to_vmem [thread:$0]  %s3228_s6, 2048, %s88_s21, [#allocation9], %s2785_s25, %s2785_s25, %s2786_s26  }
  0x89   :  { %s2681_s24 = scalar_lea.hbm %s3232_s10, 2048 }
  0x8a   :  { %p2682_p0 = scmp.ne.s32.totalorder %s3232_s10, %s2681_s24  ;;  %p2685_p1 = scmp.lt.u32.totalorder %s2681_s24, %s3232_s10 }
  0x8c   :  { %p2687_p2 = pnand %p2685_p1, %p2682_p0 }
  0x8e   :  { %2690 = shalt.err (!%p2687_p2)
}
  0x8f   :  { %s2691_s2 = scalar_lea.vmem %s3004_s11, 2048  ;;  %p2696_p4 = scmp.lt.s32.totalorder %s3004_s11, %s3004_s11 }
  0x90   :  { %p2692_p3 = scmp.ne.s32.totalorder %s3004_s11, %s2691_s2  ;;  %p2697_p5 = scmp.lt.s32.totalorder %s2691_s2, %s2691_s2 }
  0x92   :  { %p2698_p6 = por %p2697_p5, %p2696_p4 }
  0x94   :  { %p2699_p7 = pnand %p2698_p6, %p2692_p3 }
  0x96   :  { %2702 = shalt.err (!%p2699_p7)
}
  0x97   :  { %121 = dma.hbm_to_vmem [thread:$0]  %s3232_s10, 2048, %s3004_s11, [#allocation12], %s2785_s25, %s2785_s25, %s2786_s26  }
  0x98   :  { %s2793_s9 = smov [#allocation16]   ;;  %s2794_s23 = smov [#allocation17]  }
  0x99   :  { %s143_s29 = sshll.u32 %s2793_s9, 4  ;;  %s157_s5 = sshll.u32 %s2794_s23, 4  ;;  %s144_s29 = int_to_ptr.vmem [resolvable:$true] %s143_s29  ;;  %s3041_s5 = int_to_ptr.vmem [resolvable:$true] %s157_s5 }
  0x9a   :  { %s2703_s30 = scalar_lea.hbm %s3236_s14, 2048 }
  0x9b   :  { %p2704_p8 = scmp.ne.s32.totalorder %s3236_s14, %s2703_s30  ;;  %p2707_p9 = scmp.lt.u32.totalorder %s2703_s30, %s3236_s14 }
  0x9d   :  { %p2709_p10 = pnand %p2707_p9, %p2704_p8 }
  0x9f   :  { %2712 = shalt.err (!%p2709_p10)
}
  0xa0   :  { %s2713_s10 = scalar_lea.vmem %s144_s29, 2048  ;;  %p2718_p12 = scmp.lt.s32.totalorder %s144_s29, %s144_s29 }
  0xa1   :  { %p2714_p11 = scmp.ne.s32.totalorder %s144_s29, %s2713_s10  ;;  %p2719_p13 = scmp.lt.s32.totalorder %s2713_s10, %s2713_s10 }
  0xa3   :  { %p2720_p0 = por %p2719_p13, %p2718_p12 }
  0xa5   :  { %p2721_p1 = pnand %p2720_p0, %p2714_p11 }
  0xa7   :  { %2724 = shalt.err (!%p2721_p1)
}
  0xa8   :  { %149 = dma.hbm_to_vmem [thread:$0]  %s3236_s14, 2048, %s144_s29, [#allocation15], %s2785_s25, %s2785_s25, %s2786_s26  }
  0xa9   :  { %s2725_s19 = scalar_lea.hbm %s3238_s16, 2048 }
  0xaa   :  { %p2726_p2 = scmp.ne.s32.totalorder %s3238_s16, %s2725_s19  ;;  %p2729_p3 = scmp.lt.u32.totalorder %s2725_s19, %s3238_s16 }
  0xac   :  { %p2731_p4 = pnand %p2729_p3, %p2726_p2 }
  0xae   :  { %2734 = shalt.err (!%p2731_p4)
}
  0xaf   :  { %s2735_s23 = scalar_lea.vmem %s3041_s5, 2048  ;;  %p2740_p6 = scmp.lt.s32.totalorder %s3041_s5, %s3041_s5 }
  0xb0   :  { %p2736_p5 = scmp.ne.s32.totalorder %s3041_s5, %s2735_s23  ;;  %p2741_p7 = scmp.lt.s32.totalorder %s2735_s23, %s2735_s23 }
  0xb2   :  { %p2742_p8 = por %p2741_p7, %p2740_p6 }
  0xb4   :  { %p2743_p9 = pnand %p2742_p8, %p2736_p5 }
  0xb6   :  { %2746 = shalt.err (!%p2743_p9)
}
  0xb7   :  { %163 = dma.hbm_to_vmem [thread:$0]  %s3238_s16, 2048, %s3041_s5, [#allocation18], %s2785_s25, %s2785_s25, %s2786_s26  }
  0xb8   :  { %2769 = dma.done.wait [#allocation3], 256  }
  0xb9   :  { %2770 = vsyncadd [#allocation3], 4294967040 }
  0xba   :  { %2771 = dma.done.wait [#allocation6], 2304  }
  0xbb   :  { %2772 = vsyncadd [#allocation6], 4294964992 }
  0xbc   :  { %2773 = dma.done.wait [#allocation9], 4096  }
  0xbd   :  { %2774 = vsyncadd [#allocation9], 4294963200 }
  0xbe   :  { %2775 = dma.done.wait [#allocation12], 4096  }
  0xbf   :  { %2776 = vsyncadd [#allocation12], 4294963200 }
  0xc0   :  { %2777 = dma.done.wait [#allocation15], 4096  }
  0xc1   :  { %2778 = vsyncadd [#allocation15], 4294963200 }
  0xc2   :  { %2779 = dma.done.wait [#allocation18], 2048  }
  0xc3   :  { %2780 = vsyncadd [#allocation18], 4294965248  ;;  %v3078_v0 = vld [vmem:[#allocation2] sm:$0xff]  ;;  %v3081_v1 = vld [vmem:[#allocation2 + $0x8] sm:$0xff]  ;;  %v200_v14 = vlaneseq  ;;  %s3250_s28 = sld [smem:[#allocation29_spill]]  ;;  %vm2796_vm1 = vmmov 0  }
  0xc4   :  { %205 = vadd.xlane.f32.xlu0 %v3078_v0  ;;  %v245_v2 = vld [vmem:[#allocation7] sm:$0xff]  ;;  %v246_v3 = vld [vmem:[#allocation7 + $0x8] sm:$0xff]  ;;  %v247_v7 = vld [vmem:[#allocation7 + $0x10] sm:$0xff]  ;;  %vm660_vm2 = vcmask 64512   ;;  %s2797_s27 = smov [#allocation19]  }
  0xc5   :  { %v261_v4 = vld [vmem:[#allocation8] sm:$0xff]  ;;  %v2224_v5 = vpack.c.bf16 %v246_v3, %v245_v2  ;;  %v262_v6 = vld [vmem:[#allocation8 + $0x8] sm:$0xff]  ;;  %v248_v8 = vld [vmem:[#allocation7 + $0x18] sm:$0xff]  ;;  %v3084_v15 = vand.u32 127, %v200_v14  ;;  %s1715_s20 = sshll.u32 %s2797_s27, 4  ;;  %s1716_s20 = int_to_ptr.vmem [resolvable:$true] %s1715_s20 }
  0xc6   :  { %v2256_v9 = vpack.c.bf16 %v262_v6, %v261_v4  ;;  %v2228_v10 = vpack.c.bf16 %v248_v8, %v247_v7  ;;  %v263_v11 = vld [vmem:[#allocation8 + $0x10] sm:$0xff]  ;;  %v264_v12 = vld [vmem:[#allocation8 + $0x18] sm:$0xff]  ;;  %v249_v26 = vld [vmem:[#allocation7 + $0x20] sm:$0xff]  ;;  %s2747_s22 = scalar_lea.vmem %s1716_s20, 256  ;;  %p2752_p11 = scmp.lt.s32.totalorder %s1716_s20, %s1716_s20 }
  0xc7   :  { %2225 = vmatprep.subr.bf16.mxu0 %v2224_v5  ;;  %v2260_v13 = vpack.c.bf16 %v264_v12, %v263_v11  ;;  %vm202_vm0 = vcmp.lt.s32.totalorder %v3084_v15, 32  ;;  %v250_v27 = vld [vmem:[#allocation7 + $0x28] sm:$0xff]  ;;  %v265_v29 = vld [vmem:[#allocation8 + $0x20] sm:$0xff]  ;;  %v251_v32 = vld [vmem:[#allocation7 + $0x30] sm:$0xff]  ;;  %p2748_p10 = scmp.ne.s32.totalorder %s1716_s20, %s2747_s22  ;;  %p2753_p12 = scmp.lt.s32.totalorder %s2747_s22, %s2747_s22 }
  0xc8   :  { %207 = vadd.xlane.f32.xlu0 %v3081_v1  ;;  %2227 = vmatpush3.bf16.msra.mxu0 %v2224_v5  ;;  %v2232_v28 = vpack.c.bf16 %v250_v27, %v249_v26  ;;  %v266_v30 = vld [vmem:[#allocation8 + $0x28] sm:$0xff]  ;;  %v252_v33 = vld [vmem:[#allocation7 + $0x38] sm:$0xff]  ;;  %v267_v35 = vld [vmem:[#allocation8 + $0x30] sm:$0xff] }
  0xc9   :  { %2257 = vmatprep.subr.bf16.mxu1 %v2256_v9  ;;  %2229 = vmatprep.subr.bf16.mxu0 %v2228_v10  ;;  %v2264_v31 = vpack.c.bf16 %v266_v30, %v265_v29  ;;  %v2236_v34 = vpack.c.bf16 %v252_v33, %v251_v32  ;;  %v268_v36 = vld [vmem:[#allocation8 + $0x38] sm:$0xff]  ;;  %v253_v38 = vld [vmem:[#allocation7 + $0x40] sm:$0xff]  ;;  %v254_v39 = vld [vmem:[#allocation7 + $0x48] sm:$0xff]  ;;  %p2754_p13 = por %p2753_p12, %p2752_p11 }
  0xca   :  { %2259 = vmatpush3.bf16.msra.mxu1 %v2256_v9  ;;  %v2268_v37 = vpack.c.bf16 %v268_v36, %v267_v35  ;;  %v2240_v40 = vpack.c.bf16 %v254_v39, %v253_v38  ;;  %v269_v41 = vld [vmem:[#allocation8 + $0x40] sm:$0xff]  ;;  %v270_v42 = vld [vmem:[#allocation8 + $0x48] sm:$0xff]  ;;  %v255_v44 = vld [vmem:[#allocation7 + $0x50] sm:$0xff] }
  0xcb   :  { %2261 = vmatprep.subr.bf16.mxu1 %v2260_v13  ;;  %v2272_v43 = vpack.c.bf16 %v270_v42, %v269_v41  ;;  %v256_v45 = vld [vmem:[#allocation7 + $0x58] sm:$0xff]  ;;  %v271_v46 = vld [vmem:[#allocation8 + $0x50] sm:$0xff]  ;;  %v257_v49 = vld [vmem:[#allocation7 + $0x60] sm:$0xff]  ;;  %v2795_v41 = vmov 0.0   ;;  %p2755_p0 = pnand %p2754_p13, %p2748_p10 }
  0xcc   :  { %2231 = vmatpush3.bf16.msra.mxu0 %v2228_v10  ;;  %v2244_v47 = vpack.c.bf16 %v256_v45, %v255_v44  ;;  %v272_v48 = vld [vmem:[#allocation8 + $0x58] sm:$0xff]  ;;  %v258_v50 = vld [vmem:[#allocation7 + $0x68] sm:$0xff]  ;;  %v273_v53 = vld [vmem:[#allocation8 + $0x60] sm:$0xff] }
  0xcd   :  { %2233 = vmatprep.subr.bf16.mxu0 %v2232_v28  ;;  %v2276_v51 = vpack.c.bf16 %v272_v48, %v271_v46  ;;  %v2248_v52 = vpack.c.bf16 %v258_v50, %v257_v49  ;;  %v274_v54 = vld [vmem:[#allocation8 + $0x68] sm:$0xff]  ;;  %v259_v56 = vld [vmem:[#allocation7 + $0x70] sm:$0xff]  ;;  %v260_v57 = vld [vmem:[#allocation7 + $0x78] sm:$0xff] }
  0xce   :  { %2263 = vmatpush3.bf16.msra.mxu1 %v2260_v13  ;;  %v2280_v55 = vpack.c.bf16 %v274_v54, %v273_v53  ;;  %v2252_v58 = vpack.c.bf16 %v260_v57, %v259_v56  ;;  %v275_v59 = vld [vmem:[#allocation8 + $0x70] sm:$0xff]  ;;  %v276_v60 = vld [vmem:[#allocation8 + $0x78] sm:$0xff]  ;;  %v277_v62 = vld [vmem:[#allocation10] sm:$0xff] }
  0xcf   :  { %2265 = vmatprep.subr.bf16.mxu1 %v2264_v31  ;;  %v2284_v61 = vpack.c.bf16 %v276_v60, %v275_v59  ;;  %v278_v63 = vld [vmem:[#allocation10 + $0x8] sm:$0xff]  ;;  %v1732_v10 = vld [vmem:[%s3250_s28] ss:$0 sm:$0xff]  ;;  %v283_v27 = vld [vmem:[#allocation10 + $0x30] sm:$0xff] }
  0xd0   :  { %2235 = vmatpush3.bf16.msra.mxu0 %v2232_v28  ;;  %v2288_v2 = vpack.c.bf16 %v278_v63, %v277_v62  ;;  %v1733_v12 = vld [vmem:[%s3225_s3] ss:$0 sm:$0xff]  ;;  %v282_v26 = vld [vmem:[#allocation10 + $0x28] sm:$0xff]  ;;  %v284_v28 = vld [vmem:[#allocation10 + $0x38] sm:$0xff] }
  0xd1   :  { %2237 = vmatprep.subr.bf16.mxu0 %v2236_v34  ;;  %v285_v29 = vld [vmem:[#allocation10 + $0x40] sm:$0xff]  ;;  %v286_v30 = vld [vmem:[#allocation10 + $0x48] sm:$0xff]  ;;  %v287_v32 = vld [vmem:[#allocation10 + $0x50] sm:$0xff] }
  0xd2   :  { %2267 = vmatpush3.bf16.msra.mxu1 %v2264_v31  ;;  %v2304_v31 = vpack.c.bf16 %v286_v30, %v285_v29  ;;  %v288_v33 = vld [vmem:[#allocation10 + $0x58] sm:$0xff]  ;;  %v289_v35 = vld [vmem:[#allocation10 + $0x60] sm:$0xff]  ;;  %v290_v36 = vld [vmem:[#allocation10 + $0x68] sm:$0xff] }
  0xd3   :  { %2269 = vmatprep.subr.bf16.mxu1 %v2268_v37  ;;  %v291_v38 = vld [vmem:[#allocation10 + $0x70] sm:$0xff]  ;;  %v292_v39 = vld [vmem:[#allocation10 + $0x78] sm:$0xff]  ;;  %v894_v29 = vld [vmem:[#allocation13 + $0x28] sm:$0xff] }
  0xd4   :  { %2239 = vmatpush3.bf16.msra.mxu0 %v2236_v34  ;;  %v2308_v34 = vpack.c.bf16 %v288_v33, %v287_v32  ;;  %v1512_v15 = vld [vmem:[#allocation16 + $0x60] sm:$0xff] }
  0xd5   :  { %2241 = vmatprep.subr.bf16.mxu0 %v2240_v40 }
  0xd6   :  { %2271 = vmatpush3.bf16.msra.mxu1 %v2268_v37  ;;  %v2312_v37 = vpack.c.bf16 %v290_v36, %v289_v35 }
  0xd7   :  { %2273 = vmatprep.subr.bf16.mxu1 %v2272_v43 }
  0xd8   :  { %2243 = vmatpush3.bf16.msra.mxu0 %v2240_v40  ;;  %v2316_v40 = vpack.c.bf16 %v292_v39, %v291_v38 }
  0xd9   :  { %2245 = vmatprep.subr.bf16.mxu0 %v2244_v47 }
  0xda   :  { %2275 = vmatpush3.bf16.msra.mxu1 %v2272_v43 }
  0xdb   :  { %2277 = vmatprep.subr.bf16.mxu1 %v2276_v51 }
  0xdc   :  { %2247 = vmatpush3.bf16.msra.mxu0 %v2244_v47 }
  0xdd   :  { %2249 = vmatprep.subr.bf16.mxu0 %v2248_v52 }
  0xde   :  { %2279 = vmatpush3.bf16.msra.mxu1 %v2276_v51 }
  0xdf   :  { %2281 = vmatprep.subr.bf16.mxu1 %v2280_v55 }
  0xe0   :  { %2251 = vmatpush3.bf16.msra.mxu0 %v2248_v52 }
  0xe1   :  { %2253 = vmatprep.subr.bf16.mxu0 %v2252_v58 }
  0xe2   :  { %2283 = vmatpush3.bf16.msra.mxu1 %v2280_v55 }
  0xe3   :  { %2285 = vmatprep.subr.bf16.mxu1 %v2284_v61 }
  0xe4   :  { %2255 = vmatpush3.bf16.msra.mxu0 %v2252_v58 }
  0xe5   :  { %2289 = vmatprep.subr.bf16.mxu0 %v2288_v2 }
  0xe6   :  { %2287 = vmatpush3.bf16.msra.mxu1 %v2284_v61 }
  0xe7   :  { %2009 = vmatprep.subr.mxu1 %v2795_v41 }
 0x151   :  { %v206_v16 = vpop.xlane.xlu0 %205 }
 0x152   :  { %v209_v17 = vmul.f32 0.03125, %v206_v16 }
 0x154   :  { %v211_v18 = vsub.f32 %v3078_v0, %v209_v17 }
 0x155   :  { %v208_v19 = vpop.xlane.xlu0 %207 }
 0x156   :  { %v210_v20 = vmul.f32 0.03125, %v208_v19  ;;  %v3090_v21 = vsel %vm202_vm0, %v211_v18, 0.0  ;;  %v279_v18 = vld [vmem:[#allocation10 + $0x10] sm:$0xff]  ;;  %v280_v19 = vld [vmem:[#allocation10 + $0x18] sm:$0xff] }
 0x157   :  { %v215_v22 = vmul.f32 %v3090_v21, %v3090_v21 }
 0x158   :  { %v212_v23 = vsub.f32 %v3081_v1, %v210_v20 }
 0x159   :  { %217 = vadd.xlane.f32.xlu1 %v215_v22 }
 0x15a   :  { %v3097_v24 = vsel %vm202_vm0, %v212_v23, 0.0  ;;  %v2292_v23 = vpack.c.bf16 %v280_v19, %v279_v18  ;;  %v890_v18 = vld [vmem:[#allocation13 + $0x8] sm:$0xff]  ;;  %v873_v19 = vld [vmem:[#allocation11] sm:$0xff] }
 0x15b   :  { %v216_v25 = vmul.f32 %v3097_v24, %v3097_v24 }
 0x15d   :  { %219 = vadd.xlane.f32.xlu1 %v216_v25  ;;  %v281_v25 = vld [vmem:[#allocation10 + $0x20] sm:$0xff] }
 0x1e6   :  { %v218_v3 = vpop.xlane.xlu1 %217 }
 0x1e7   :  { %v221_v4 = vmul.f32 0.03125, %v218_v3 }
 0x1e9   :  { %v223_v5 = vadd.f32 1e-05, %v221_v4 }
 0x1ea   :  { %v220_v6 = vpop.xlane.xlu1 %219 }
 0x1eb   :  { %2495 = vrsqrt.f32 %v223_v5  ;;  %v222_v7 = vmul.f32 0.03125, %v220_v6 }
 0x1ed   :  { %v224_v8 = vadd.f32 1e-05, %v222_v7 }
 0x1ef   :  { %2497 = vrsqrt.f32 %v224_v8 }
 0x1f5   :  { %v2496_v9 = vpop.eup %2495 }
 0x1f6   :  { %v227_v11 = vmul.f32 %v2496_v9, %v3090_v21  ;;  %v2296_v21 = vpack.c.bf16 %v282_v26, %v281_v25  ;;  %v892_v25 = vld [vmem:[#allocation13 + $0x18] sm:$0xff] }
 0x1f8   :  { %v235_v13 = vmul.f32 %v1732_v10, %v227_v11 }
 0x1f9   :  { %v2498_v14 = vpop.eup %2497 }
 0x1fa   :  { %v243_v16 = vadd.f32 %v1733_v12, %v235_v13  ;;  %v228_v17 = vmul.f32 %v2498_v14, %v3097_v24  ;;  %v2300_v24 = vpack.c.bf16 %v284_v28, %v283_v27  ;;  %v876_v27 = vld [vmem:[#allocation11 + $0x18] sm:$0xff]  ;;  %v893_v28 = vld [vmem:[#allocation13 + $0x20] sm:$0xff] }
 0x1fc   :  { %1936 = vmatprep.mubr.f32.mxu0 %v243_v16  ;;  %1971 = vmatprep.mubr.f32.mxu1 %v243_v16  ;;  %v236_v20 = vmul.f32 %v1732_v10, %v228_v17  ;;  %v889_v17 = vld [vmem:[#allocation13] sm:$0xff] }
 0x1fe   :  { %v244_v22 = vadd.f32 %v1733_v12, %v236_v20  ;;  %v2352_v20 = vpack.c.bf16 %v890_v18, %v889_v17 }
 0x200   :  { %1937 = vmatmul.mubr.f32.vlgmr.msra.gmra.mrb[0].mxu0 %v244_v22  ;;  %1972 = vmatmul.mubr.f32.vlgmr.msra.gmra.mrb[0].mxu1 %v244_v22 }
 0x201   :  { %2291 = vmatpush3.bf16.msra.mxu0 %v2288_v2  ;;  %2006 = vmatprep.mubr.f32.mxu0 %v243_v16 }
 0x202   :  { %2293 = vmatprep.subr.bf16.mxu0 %v2292_v23  ;;  %2011 = vmatprep.mubr.msk.f32.mxu1 %vm2796_vm1, %v2795_v41 }
 0x205   :  { %2295 = vmatpush3.bf16.msra.mxu0 %v2292_v23  ;;  %v891_v23 = vld [vmem:[#allocation13 + $0x10] sm:$0xff] }
 0x206   :  { %2297 = vmatprep.subr.bf16.mxu0 %v2296_v21 }
 0x209   :  { %2299 = vmatpush3.bf16.msra.mxu0 %v2296_v21  ;;  %v875_v21 = vld [vmem:[#allocation11 + $0x10] sm:$0xff] }
 0x20a   :  { %2301 = vmatprep.subr.bf16.mxu0 %v2300_v24 }
 0x20d   :  { %2303 = vmatpush3.bf16.msra.mxu0 %v2300_v24  ;;  %v2324_v24 = vpack.c.bf16 %v876_v27, %v875_v21  ;;  %v1737_v21 = vld [vmem:[%s3230_s8] ss:$0 sm:$0xff] }
 0x20e   :  { %2305 = vmatprep.subr.bf16.mxu0 %v2304_v31 }
 0x211   :  { %2307 = vmatpush3.bf16.msra.mxu0 %v2304_v31 }
 0x212   :  { %2309 = vmatprep.subr.bf16.mxu0 %v2308_v34 }
 0x215   :  { %2311 = vmatpush3.bf16.msra.mxu0 %v2308_v34 }
 0x216   :  { %2313 = vmatprep.subr.bf16.mxu0 %v2312_v37 }
 0x219   :  { %2315 = vmatpush3.bf16.msra.mxu0 %v2312_v37 }
 0x21a   :  { %2317 = vmatprep.subr.bf16.mxu0 %v2316_v40 }
 0x21d   :  { %2319 = vmatpush3.bf16.msra.mxu0 %v2316_v40  ;;  %v877_v40 = vld [vmem:[#allocation11 + $0x20] sm:$0xff] }
 0x21e   :  { %2353 = vmatprep.subr.bf16.mxu0 %v2352_v20 }
 0x220   :  { %2007 = vmatmul.mubr.f32.vlgmr.msra.gmra.mrb[2].mxu0 %v244_v22  ;;  %v874_v22 = vld [vmem:[#allocation11 + $0x8] sm:$0xff] }
 0x221   :  { %v2320_v26 = vpack.c.bf16 %v874_v22, %v873_v19  ;;  %2355 = vmatpush3.bf16.msra.mxu0 %v2352_v20 }
 0x2d3   :  { %v1938_v42 = vpop.f32.mrb[0].mxu0  ;;  %v1973_v43 = vpop.f32.mrb[0].mxu1 }
 0x2d4   :  { %v359_v44 = vpop.f32.mrb[1].mxu0  ;;  %v436_v45 = vpop.f32.mrb[1].mxu1  ;;  %v369_v47 = vmul.f32 0.17677669, %v1938_v42  ;;  %v878_v42 = vld [vmem:[#allocation11 + $0x28] sm:$0xff] }
 0x2d5   :  { %v368_v46 = vmul.f32 0.17677669, %v359_v44  ;;  %2010 = vmatpush3.xpose.msra.mxu1 %v436_v45  ;;  %v895_v44 = vld [vmem:[#allocation13 + $0x30] sm:$0xff]  ;;  %v896_v45 = vld [vmem:[#allocation13 + $0x38] sm:$0xff] }
 0x2d6   :  { %2014 = vmatprep.subr.mxu1 %v2795_v41 }
 0x2d8   :  { %2012 = vmatmul.mubr.f32.vlgmr.msra.gmra.mrb[2].mxu1 %v368_v46  ;;  %v2364_v46 = vpack.c.bf16 %v896_v45, %v895_v44  ;;  %v909_v44 = vld [vmem:[#allocation14 + $0x20] sm:$0xff]  ;;  %v910_v45 = vld [vmem:[#allocation14 + $0x28] sm:$0xff] }
 0x2d9   :  { %2015 = vmatpush3.xpose.msra.mxu1 %v1973_v43  ;;  %2016 = vmatprep.mubr.msk.f32.mxu1 %vm2796_vm1, %v2795_v41  ;;  %v2328_v43 = vpack.c.bf16 %v878_v42, %v877_v40  ;;  %v908_v42 = vld [vmem:[#allocation14 + $0x18] sm:$0xff] }
 0x2da   :  { %2019 = vmatprep.subr.mxu1 %v2795_v41 }
 0x2dc   :  { %2017 = vmatmul.mubr.f32.vlgmr.msra.gmra.mrb[4].mxu1 %v369_v47  ;;  %v879_v47 = vld [vmem:[#allocation11 + $0x30] sm:$0xff] }
 0x2dd   :  { %2021 = vmatprep.mubr.msk.f32.mxu1 %vm2796_vm1, %v2795_v41 }
 0x2f3   :  { %v2008_v48 = vpop.f32.mrb[2].mxu0 }
 0x2f4   :  { %v511_v49 = vpop.f32.mrb[3].mxu0 }
 0x2f5   :  { %2020 = vmatpush3.msra.mxu1 %v511_v49 }
 0x2f6   :  { %2024 = vmatprep.subr.mxu1 %v2795_v41 }
 0x3ab   :  { %v586_v50 = vpop.f32.mrb[2].mxu1 }
 0x3ac   :  { %v2013_v51 = vpop.f32.mrb[3].mxu1  ;;  %v661_v52 = vsel %vm660_vm2, %v586_v50, -inf }
 0x3ad   :  { %662 = vmax.xlane.f32.xlu0 %v661_v52  ;;  %v898_v51 = vld [vmem:[#allocation13 + $0x48] sm:$0xff] }
 0x3af   :  { %v656_v53 = vpop.f32.mrb[4].mxu1 }
 0x3b0   :  { %v2018_v54 = vpop.f32.mrb[5].mxu1  ;;  %v664_v55 = vsel %vm660_vm2, %v656_v53, -inf }
 0x3b1   :  { %665 = vmax.xlane.f32.xlu1 %v664_v55  ;;  %v882_v54 = vld [vmem:[#allocation11 + $0x48] sm:$0xff] }
 0x43a   :  { %v663_v56 = vpop.xlane.xlu0 %662 }
 0x43b   :  { %v667_v57 = vsub.f32 %v586_v50, %v663_v56  ;;  %v897_v50 = vld [vmem:[#allocation13 + $0x40] sm:$0xff]  ;;  %v899_v56 = vld [vmem:[#allocation13 + $0x50] sm:$0xff] }
 0x43c   :  { %v2368_v52 = vpack.c.bf16 %v898_v51, %v897_v50  ;;  %v913_v50 = vld [vmem:[#allocation14 + $0x40] sm:$0xff]  ;;  %v914_v51 = vld [vmem:[#allocation14 + $0x48] sm:$0xff] }
 0x43d   :  { %v669_v58 = vmul.f32 1.442695, %v667_v57  ;;  %v900_v57 = vld [vmem:[#allocation13 + $0x58] sm:$0xff] }
 0x43e   :  { %v666_v59 = vpop.xlane.xlu1 %665 }
 0x43f   :  { %2499 = vpow2.f32 %v669_v58  ;;  %v668_v60 = vsub.f32 %v656_v53, %v666_v59  ;;  %v881_v53 = vld [vmem:[#allocation11 + $0x40] sm:$0xff]  ;;  %v883_v58 = vld [vmem:[#allocation11 + $0x50] sm:$0xff]  ;;  %v2372_v59 = vpack.c.bf16 %v900_v57, %v899_v56  ;;  %v918_v57 = vld [vmem:[#allocation14 + $0x68] sm:$0xff] }
 0x440   :  { %v2336_v55 = vpack.c.bf16 %v882_v54, %v881_v53  ;;  %v915_v53 = vld [vmem:[#allocation14 + $0x50] sm:$0xff]  ;;  %v916_v54 = vld [vmem:[#allocation14 + $0x58] sm:$0xff]  ;;  %v917_v56 = vld [vmem:[#allocation14 + $0x60] sm:$0xff] }
 0x441   :  { %v671_v61 = vmul.f32 1.442695, %v668_v60  ;;  %v884_v60 = vld [vmem:[#allocation11 + $0x58] sm:$0xff] }
 0x443   :  { %2501 = vpow2.f32 %v671_v61  ;;  %v901_v61 = vld [vmem:[#allocation13 + $0x60] sm:$0xff] }
 0x449   :  { %v2500_v62 = vpop.eup %2499 }
 0x44a   :  { %v673_v63 = vsel %vm660_vm2, %v2500_v62, 0.0 }
 0x44b   :  { %674 = vadd.xlane.f32.xlu0 %v673_v63  ;;  %v2340_v63 = vpack.c.bf16 %v884_v60, %v883_v58  ;;  %v2408_v58 = vpack.c.bf16 %v918_v57, %v917_v56  ;;  %v920_v60 = vld [vmem:[#allocation14 + $0x78] sm:$0xff]  ;;  %v1513_v57 = vld [vmem:[#allocation16 + $0x68] sm:$0xff] }
 0x44d   :  { %v2502_v2 = vpop.eup %2501 }
 0x44e   :  { %v676_v3 = vsel %vm660_vm2, %v2502_v2, 0.0 }
 0x44f   :  { %677 = vadd.xlane.f32.xlu1 %v676_v3  ;;  %v885_v3 = vld [vmem:[#allocation11 + $0x60] sm:$0xff] }
 0x4d8   :  { %v675_v4 = vpop.xlane.xlu0 %674 }
 0x4d9   :  { %2503 = vrcp.f32 %v675_v4  ;;  %v886_v4 = vld [vmem:[#allocation11 + $0x68] sm:$0xff] }
 0x4dc   :  { %v678_v5 = vpop.xlane.xlu1 %677 }
 0x4dd   :  { %2505 = vrcp.f32 %v678_v5  ;;  %v903_v5 = vld [vmem:[#allocation13 + $0x70] sm:$0xff] }
 0x4e3   :  { %v2504_v6 = vpop.eup %2503 }
 0x4e4   :  { %v681_v7 = vmul.f32 %v2504_v6, %v2500_v62  ;;  %v902_v62 = vld [vmem:[#allocation13 + $0x68] sm:$0xff]  ;;  %v904_v6 = vld [vmem:[#allocation13 + $0x78] sm:$0xff] }
 0x4e6   :  { %2022 = vmatmul.mubr.msk.f32.vlgmr.msra.gmra.mrb[6].mxu1 %vm660_vm2, %v681_v7  ;;  %v2344_v7 = vpack.c.bf16 %v886_v4, %v885_v3 }
 0x4e7   :  { %v2506_v8 = vpop.eup %2505  ;;  %2025 = vmatpush3.msra.mxu1 %v2008_v48  ;;  %2026 = vmatprep.mubr.msk.f32.mxu1 %vm2796_vm1, %v2795_v41  ;;  %v880_v48 = vld [vmem:[#allocation11 + $0x38] sm:$0xff] }
 0x4e8   :  { %v682_v9 = vmul.f32 %v2506_v8, %v2502_v2  ;;  %2321 = vmatprep.subr.bf16.mxu1 %v2320_v26  ;;  %v2332_v49 = vpack.c.bf16 %v880_v48, %v879_v47  ;;  %v2376_v2 = vpack.c.bf16 %v902_v62, %v901_v61  ;;  %v887_v8 = vld [vmem:[#allocation11 + $0x70] sm:$0xff]  ;;  %v912_v48 = vld [vmem:[#allocation14 + $0x38] sm:$0xff] }
 0x4e9   :  { %v911_v47 = vld [vmem:[#allocation14 + $0x30] sm:$0xff] }
 0x4ea   :  { %2027 = vmatmul.mubr.msk.f32.vlgmr.msra.gmra.mrb[8].mxu1 %vm660_vm2, %v682_v9  ;;  %v888_v9 = vld [vmem:[#allocation11 + $0x78] sm:$0xff] }
 0x4eb   :  { %2323 = vmatpush3.bf16.msra.mxu1 %v2320_v26  ;;  %v1736_v26 = vld [vmem:[%s3229_s7] ss:$0 sm:$0xff] }
 0x4ec   :  { %2325 = vmatprep.subr.bf16.mxu1 %v2324_v24 }
 0x4ef   :  { %2327 = vmatpush3.bf16.msra.mxu1 %v2324_v24 }
 0x4f0   :  { %2329 = vmatprep.subr.bf16.mxu1 %v2328_v43 }
 0x4f3   :  { %2331 = vmatpush3.bf16.msra.mxu1 %v2328_v43 }
 0x4f4   :  { %2333 = vmatprep.subr.bf16.mxu1 %v2332_v49 }
 0x4f7   :  { %2335 = vmatpush3.bf16.msra.mxu1 %v2332_v49  ;;  %v2396_v49 = vpack.c.bf16 %v912_v48, %v911_v47  ;;  %v1506_v48 = vld [vmem:[#allocation16 + $0x30] sm:$0xff] }
 0x4f8   :  { %2337 = vmatprep.subr.bf16.mxu1 %v2336_v55 }
 0x4fb   :  { %2339 = vmatpush3.bf16.msra.mxu1 %v2336_v55  ;;  %v2404_v55 = vpack.c.bf16 %v916_v54, %v915_v53  ;;  %v1510_v54 = vld [vmem:[#allocation16 + $0x50] sm:$0xff] }
 0x4fc   :  { %2341 = vmatprep.subr.bf16.mxu1 %v2340_v63 }
 0x4ff   :  { %2343 = vmatpush3.bf16.msra.mxu1 %v2340_v63 }
 0x500   :  { %2345 = vmatprep.subr.bf16.mxu1 %v2344_v7 }
 0x503   :  { %2347 = vmatpush3.bf16.msra.mxu1 %v2344_v7 }
 0x5b9   :  { %v752_v10 = vpop.f32.mrb[6].mxu1 }
 0x5ba   :  { %v3128_v11 = vadd.f32 %v752_v10, %v3078_v0  ;;  %v2023_v12 = vpop.f32.mrb[7].mxu1  ;;  %v2356_v0 = vpack.c.bf16 %v892_v25, %v891_v23  ;;  %v2380_v10 = vpack.c.bf16 %v904_v6, %v903_v5 }
 0x5bb   :  { %v2348_v12 = vpack.c.bf16 %v888_v9, %v887_v8 }
 0x5bc   :  { %833 = vadd.xlane.f32.xlu0 %v3128_v11  ;;  %2357 = vmatprep.subr.bf16.mxu0 %v2356_v0 }
 0x5bd   :  { %v825_v13 = vpop.f32.mrb[8].mxu1  ;;  %2359 = vmatpush3.bf16.msra.mxu0 %v2356_v0  ;;  %2349 = vmatprep.subr.bf16.mxu1 %v2348_v12 }
 0x5be   :  { %v3132_v14 = vadd.f32 %v825_v13, %v3081_v1  ;;  %v2028_v16 = vpop.f32.mrb[9].mxu1  ;;  %v2360_v1 = vpack.c.bf16 %v894_v29, %v893_v28  ;;  %v198_v13 = vld [vmem:[#allocation5] sm:$0xff]  ;;  %2351 = vmatpush3.bf16.msra.mxu1 %v2348_v12 }
 0x5bf   :  { %2096 = vmatprep.mubr.f32.mxu0 %v198_v13  ;;  %v3150_v16 = vld [vmem:[#allocation5 + $0x8] sm:$0xff] }
 0x5c0   :  { %835 = vadd.xlane.f32.xlu1 %v3132_v14  ;;  %2361 = vmatprep.subr.bf16.mxu0 %v2360_v1 }
 0x5c1   :  { %2363 = vmatpush3.bf16.msra.mxu0 %v2360_v1 }
 0x5c2   :  { %2365 = vmatprep.subr.bf16.mxu0 %v2364_v46 }
 0x5c5   :  { %2367 = vmatpush3.bf16.msra.mxu0 %v2364_v46  ;;  %v2392_v46 = vpack.c.bf16 %v910_v45, %v909_v44  ;;  %v1504_v45 = vld [vmem:[#allocation16 + $0x20] sm:$0xff] }
 0x5c6   :  { %2369 = vmatprep.subr.bf16.mxu0 %v2368_v52 }
 0x5c9   :  { %2371 = vmatpush3.bf16.msra.mxu0 %v2368_v52  ;;  %v2400_v52 = vpack.c.bf16 %v914_v51, %v913_v50  ;;  %v1508_v51 = vld [vmem:[#allocation16 + $0x40] sm:$0xff] }
 0x5ca   :  { %2373 = vmatprep.subr.bf16.mxu0 %v2372_v59 }
 0x5cd   :  { %2375 = vmatpush3.bf16.msra.mxu0 %v2372_v59  ;;  %v919_v59 = vld [vmem:[#allocation14 + $0x70] sm:$0xff] }
 0x5ce   :  { %2377 = vmatprep.subr.bf16.mxu0 %v2376_v2  ;;  %v2412_v61 = vpack.c.bf16 %v920_v60, %v919_v59  ;;  %v1514_v59 = vld [vmem:[#allocation16 + $0x70] sm:$0xff]  ;;  %v1515_v60 = vld [vmem:[#allocation16 + $0x78] sm:$0xff] }
 0x5d1   :  { %2379 = vmatpush3.bf16.msra.mxu0 %v2376_v2 }
 0x5d2   :  { %2381 = vmatprep.subr.bf16.mxu0 %v2380_v10 }
 0x5d5   :  { %2383 = vmatpush3.bf16.msra.mxu0 %v2380_v10 }
 0x5d6   :  { %2134 = vmatprep.subr.mxu0 %v2795_v41 }
 0x5d8   :  { %2097 = vmatmul.mubr.f32.vlgmr.msra.gmra.mrb[4].mxu0 %v3150_v16 }
 0x5d9   :  { %2136 = vmatprep.mubr.msk.f32.mxu0 %vm2796_vm1, %v2795_v41 }
 0x649   :  { %v834_v30 = vpop.xlane.xlu0 %833 }
 0x64a   :  { %v837_v31 = vmul.f32 0.03125, %v834_v30 }
 0x64c   :  { %v839_v32 = vsub.f32 %v3128_v11, %v837_v31 }
 0x64d   :  { %v836_v33 = vpop.xlane.xlu1 %835 }
 0x64e   :  { %v838_v34 = vmul.f32 0.03125, %v836_v33  ;;  %v3138_v35 = vsel %vm202_vm0, %v839_v32, 0.0 }
 0x64f   :  { %v843_v36 = vmul.f32 %v3138_v35, %v3138_v35 }
 0x650   :  { %v840_v37 = vsub.f32 %v3132_v14, %v838_v34 }
 0x651   :  { %845 = vadd.xlane.f32.xlu0 %v843_v36 }
 0x652   :  { %v3145_v38 = vsel %vm202_vm0, %v840_v37, 0.0  ;;  %v905_v37 = vld [vmem:[#allocation14] sm:$0xff] }
 0x653   :  { %v844_v39 = vmul.f32 %v3145_v38, %v3145_v38 }
 0x655   :  { %847 = vadd.xlane.f32.xlu1 %v844_v39  ;;  %v907_v39 = vld [vmem:[#allocation14 + $0x10] sm:$0xff] }
 0x656   :  { %v2388_v43 = vpack.c.bf16 %v908_v42, %v907_v39 }
 0x6ab   :  { %v2098_v31 = vpop.f32.mrb[4].mxu0 }
 0x6ac   :  { %v1064_v32 = vpop.f32.mrb[5].mxu0 }
 0x6ad   :  { %2135 = vmatpush3.xpose.msra.mxu0 %v1064_v32  ;;  %v1501_v32 = vld [vmem:[#allocation16 + $0x8] sm:$0xff] }
 0x6ae   :  { %2139 = vmatprep.subr.mxu0 %v2795_v41 }
 0x6de   :  { %v846_v17 = vpop.xlane.xlu0 %845 }
 0x6df   :  { %v849_v18 = vmul.f32 0.03125, %v846_v17 }
 0x6e1   :  { %v851_v19 = vadd.f32 1e-05, %v849_v18 }
 0x6e2   :  { %v848_v20 = vpop.xlane.xlu1 %847 }
 0x6e3   :  { %2507 = vrsqrt.f32 %v851_v19  ;;  %v850_v22 = vmul.f32 0.03125, %v848_v20 }
 0x6e5   :  { %v852_v23 = vadd.f32 1e-05, %v850_v22 }
 0x6e7   :  { %2509 = vrsqrt.f32 %v852_v23 }
 0x6ed   :  { %v2508_v25 = vpop.eup %2507 }
 0x6ee   :  { %v855_v0 = vmul.f32 %v2508_v25, %v3138_v35 }
 0x6f0   :  { %v863_v27 = vmul.f32 %v1736_v26, %v855_v0 }
 0x6f1   :  { %v2510_v28 = vpop.eup %2509 }
 0x6f2   :  { %v856_v24 = vmul.f32 %v2510_v28, %v3145_v38  ;;  %v871_v29 = vadd.f32 %v1737_v21, %v863_v27  ;;  %v906_v38 = vld [vmem:[#allocation14 + $0x8] sm:$0xff] }
 0x6f3   :  { %v2384_v40 = vpack.c.bf16 %v906_v38, %v905_v37 }
 0x6f4   :  { %v864_v1 = vmul.f32 %v1736_v26, %v856_v24  ;;  %2061 = vmatprep.mubr.f32.mxu1 %v871_v29 }
 0x6f5   :  { %2385 = vmatprep.subr.bf16.mxu1 %v2384_v40 }
 0x6f6   :  { %v872_v30 = vadd.f32 %v1737_v21, %v864_v1 }
 0x6f8   :  { %2062 = vmatmul.mubr.f32.vlgmr.msra.gmra.mrb[10].mxu1 %v872_v30 }
 0x6f9   :  { %2131 = vmatprep.mubr.f32.mxu1 %v198_v13  ;;  %2387 = vmatpush3.bf16.msra.mxu1 %v2384_v40 }
 0x6fa   :  { %2389 = vmatprep.subr.bf16.mxu1 %v2388_v43 }
 0x6fd   :  { %2391 = vmatpush3.bf16.msra.mxu1 %v2388_v43 }
 0x6fe   :  { %2393 = vmatprep.subr.bf16.mxu1 %v2392_v46 }
 0x701   :  { %2395 = vmatpush3.bf16.msra.mxu1 %v2392_v46  ;;  %v1505_v46 = vld [vmem:[#allocation16 + $0x28] sm:$0xff] }
 0x702   :  { %2397 = vmatprep.subr.bf16.mxu1 %v2396_v49  ;;  %v2424_v47 = vpack.c.bf16 %v1505_v46, %v1504_v45 }
 0x705   :  { %2399 = vmatpush3.bf16.msra.mxu1 %v2396_v49  ;;  %v1507_v49 = vld [vmem:[#allocation16 + $0x38] sm:$0xff] }
 0x706   :  { %2401 = vmatprep.subr.bf16.mxu1 %v2400_v52  ;;  %v2428_v50 = vpack.c.bf16 %v1507_v49, %v1506_v48 }
 0x709   :  { %2403 = vmatpush3.bf16.msra.mxu1 %v2400_v52  ;;  %v1509_v52 = vld [vmem:[#allocation16 + $0x48] sm:$0xff] }
 0x70a   :  { %2405 = vmatprep.subr.bf16.mxu1 %v2404_v55  ;;  %v2432_v53 = vpack.c.bf16 %v1509_v52, %v1508_v51 }
 0x70d   :  { %2407 = vmatpush3.bf16.msra.mxu1 %v2404_v55  ;;  %v1511_v55 = vld [vmem:[#allocation16 + $0x58] sm:$0xff] }
 0x70e   :  { %2409 = vmatprep.subr.bf16.mxu1 %v2408_v58  ;;  %v2436_v56 = vpack.c.bf16 %v1511_v55, %v1510_v54 }
 0x711   :  { %2411 = vmatpush3.bf16.msra.mxu1 %v2408_v58  ;;  %v2440_v58 = vpack.c.bf16 %v1513_v57, %v1512_v15 }
 0x712   :  { %2413 = vmatprep.subr.bf16.mxu1 %v2412_v61 }
 0x715   :  { %2415 = vmatpush3.bf16.msra.mxu1 %v2412_v61  ;;  %v2444_v61 = vpack.c.bf16 %v1515_v60, %v1514_v59 }
 0x718   :  { %2132 = vmatmul.mubr.f32.vlgmr.msra.gmra.mrb[12].mxu1 %v3150_v16 }
 0x7cb   :  { %v2063_v33 = vpop.f32.mrb[10].mxu1 }
 0x7cc   :  { %v987_v34 = vpop.f32.mrb[11].mxu1  ;;  %v997_v36 = vmul.f32 0.17677669, %v2063_v33 }
 0x7cd   :  { %v996_v35 = vmul.f32 0.17677669, %v987_v34  ;;  %v1503_v34 = vld [vmem:[#allocation16 + $0x18] sm:$0xff] }
 0x7cf   :  { %2137 = vmatmul.mubr.f32.vlgmr.msra.gmra.mrb[6].mxu0 %v996_v35 }
 0x7d0   :  { %2140 = vmatpush3.xpose.msra.mxu0 %v2098_v31  ;;  %2141 = vmatprep.mubr.msk.f32.mxu0 %vm2796_vm1, %v2795_v41  ;;  %v1500_v31 = vld [vmem:[#allocation16] sm:$0xff] }
 0x7d1   :  { %2144 = vmatprep.subr.mxu0 %v2795_v41  ;;  %v2416_v33 = vpack.c.bf16 %v1501_v32, %v1500_v31  ;;  %v1616_v31 = vld [vmem:[#allocation17 + $0x40] sm:$0xff]  ;;  %v1617_v32 = vld [vmem:[#allocation17 + $0x48] sm:$0xff] }
 0x7d3   :  { %2142 = vmatmul.mubr.f32.vlgmr.msra.gmra.mrb[8].mxu0 %v997_v36 }
 0x7d4   :  { %2146 = vmatprep.mubr.msk.f32.mxu0 %vm2796_vm1, %v2795_v41 }
 0x7eb   :  { %v2133_v19 = vpop.f32.mrb[12].mxu1 }
 0x7ec   :  { %v1139_v20 = vpop.f32.mrb[13].mxu1 }
 0x7ed   :  { %2145 = vmatpush3.msra.mxu0 %v1139_v20 }
 0x7ee   :  { %2149 = vmatprep.subr.mxu0 %v2795_v41 }
 0x8a2   :  { %v1214_v62 = vpop.f32.mrb[6].mxu0 }
 0x8a3   :  { %v2138_v63 = vpop.f32.mrb[7].mxu0  ;;  %v1288_v2 = vsel %vm660_vm2, %v1214_v62, -inf }
 0x8a4   :  { %1289 = vmax.xlane.f32.xlu0 %v1288_v2  ;;  %v1609_v63 = vld [vmem:[#allocation17 + $0x8] sm:$0xff]  ;;  %v1610_v2 = vld [vmem:[#allocation17 + $0x10] sm:$0xff] }
 0x8a6   :  { %v1284_v3 = vpop.f32.mrb[8].mxu0 }
 0x8a7   :  { %v2143_v4 = vpop.f32.mrb[9].mxu0  ;;  %v1291_v5 = vsel %vm660_vm2, %v1284_v3, -inf }
 0x8a8   :  { %1292 = vmax.xlane.f32.xlu1 %v1291_v5  ;;  %v1611_v4 = vld [vmem:[#allocation17 + $0x18] sm:$0xff] }
 0x8a9   :  { %v2452_v5 = vpack.c.bf16 %v1611_v4, %v1610_v2 }
 0x931   :  { %v1290_v6 = vpop.xlane.xlu0 %1289 }
 0x932   :  { %v1294_v7 = vsub.f32 %v1214_v62, %v1290_v6  ;;  %v1608_v62 = vld [vmem:[#allocation17] sm:$0xff] }
 0x933   :  { %v1612_v6 = vld [vmem:[#allocation17 + $0x20] sm:$0xff] }
 0x934   :  { %v1296_v8 = vmul.f32 1.442695, %v1294_v7  ;;  %v1613_v7 = vld [vmem:[#allocation17 + $0x28] sm:$0xff] }
 0x935   :  { %v1293_v9 = vpop.xlane.xlu1 %1292 }
 0x936   :  { %2511 = vpow2.f32 %v1296_v8  ;;  %v1295_v10 = vsub.f32 %v1284_v3, %v1293_v9  ;;  %v2448_v3 = vpack.c.bf16 %v1609_v63, %v1608_v62  ;;  %v2456_v8 = vpack.c.bf16 %v1613_v7, %v1612_v6 }
 0x938   :  { %v1298_v12 = vmul.f32 1.442695, %v1295_v10  ;;  %2449 = vmatprep.subr.bf16.mxu1 %v2448_v3 }
 0x939   :  { %2451 = vmatpush3.bf16.msra.mxu1 %v2448_v3 }
 0x93a   :  { %2513 = vpow2.f32 %v1298_v12  ;;  %2453 = vmatprep.subr.bf16.mxu1 %v2452_v5 }
 0x93d   :  { %2455 = vmatpush3.bf16.msra.mxu1 %v2452_v5 }
 0x93e   :  { %2457 = vmatprep.subr.bf16.mxu1 %v2456_v8 }
 0x940   :  { %v2512_v13 = vpop.eup %2511 }
 0x941   :  { %v1300_v16 = vsel %vm660_vm2, %v2512_v13, 0.0  ;;  %2459 = vmatpush3.bf16.msra.mxu1 %v2456_v8 }
 0x942   :  { %1301 = vadd.xlane.f32.xlu0 %v1300_v16 }
 0x944   :  { %v2514_v17 = vpop.eup %2513 }
 0x945   :  { %v1303_v18 = vsel %vm660_vm2, %v2514_v17, 0.0 }
 0x946   :  { %1304 = vadd.xlane.f32.xlu1 %v1303_v18 }
 0x9cf   :  { %v1302_v22 = vpop.xlane.xlu0 %1301 }
 0x9d0   :  { %2515 = vrcp.f32 %v1302_v22  ;;  %v1741_v22 = vld [vmem:[%s3235_s13] ss:$0 sm:$0xff] }
 0x9d3   :  { %v1305_v23 = vpop.xlane.xlu1 %1304 }
 0x9d4   :  { %2517 = vrcp.f32 %v1305_v23 }
 0x9da   :  { %v2516_v25 = vpop.eup %2515 }
 0x9db   :  { %v1308_v26 = vmul.f32 %v2516_v25, %v2512_v13 }
 0x9dd   :  { %2147 = vmatmul.mubr.msk.f32.vlgmr.msra.gmra.mrb[10].mxu0 %vm660_vm2, %v1308_v26 }
 0x9de   :  { %v2518_v0 = vpop.eup %2517  ;;  %2150 = vmatpush3.msra.mxu0 %v2133_v19  ;;  %2151 = vmatprep.mubr.msk.f32.mxu0 %vm2796_vm1, %v2795_v41  ;;  %v1502_v41 = vld [vmem:[#allocation16 + $0x10] sm:$0xff]  ;;  %v1740_v19 = vld [vmem:[%s3234_s12] ss:$0 sm:$0xff] }
 0x9df   :  { %v1309_v21 = vmul.f32 %v2518_v0, %v2514_v17  ;;  %v2420_v35 = vpack.c.bf16 %v1503_v34, %v1502_v41  ;;  %2417 = vmatprep.subr.bf16.mxu0 %v2416_v33  ;;  %v2464_v41 = vpack.c.bf16 %v1617_v32, %v1616_v31  ;;  %v1619_v34 = vld [vmem:[#allocation17 + $0x58] sm:$0xff] }
 0x9e1   :  { %2152 = vmatmul.mubr.msk.f32.vlgmr.msra.gmra.mrb[12].mxu0 %vm660_vm2, %v1309_v21 }
 0x9e2   :  { %2419 = vmatpush3.bf16.msra.mxu0 %v2416_v33  ;;  %v1618_v33 = vld [vmem:[#allocation17 + $0x50] sm:$0xff] }
 0x9e3   :  { %2421 = vmatprep.subr.bf16.mxu0 %v2420_v35 }
 0x9e6   :  { %2423 = vmatpush3.bf16.msra.mxu0 %v2420_v35  ;;  %v2468_v35 = vpack.c.bf16 %v1619_v34, %v1618_v33 }
 0x9e7   :  { %2425 = vmatprep.subr.bf16.mxu0 %v2424_v47 }
 0x9ea   :  { %2427 = vmatpush3.bf16.msra.mxu0 %v2424_v47 }
 0x9eb   :  { %2429 = vmatprep.subr.bf16.mxu0 %v2428_v50 }
 0x9ee   :  { %2431 = vmatpush3.bf16.msra.mxu0 %v2428_v50 }
 0x9ef   :  { %2433 = vmatprep.subr.bf16.mxu0 %v2432_v53 }
 0x9f2   :  { %2435 = vmatpush3.bf16.msra.mxu0 %v2432_v53 }
 0x9f3   :  { %2437 = vmatprep.subr.bf16.mxu0 %v2436_v56 }
 0x9f6   :  { %2439 = vmatpush3.bf16.msra.mxu0 %v2436_v56  ;;  %v1743_v56 = vld [vmem:[%s3239_s17] ss:$0 sm:$0xff] }
 0x9f7   :  { %2441 = vmatprep.subr.bf16.mxu0 %v2440_v58 }
 0x9fa   :  { %2443 = vmatpush3.bf16.msra.mxu0 %v2440_v58 }
 0x9fb   :  { %2445 = vmatprep.subr.bf16.mxu0 %v2444_v61 }
 0x9fe   :  { %2447 = vmatpush3.bf16.msra.mxu0 %v2444_v61 }
 0xab0   :  { %v1379_v27 = vpop.f32.mrb[10].mxu0 }
 0xab1   :  { %v3180_v28 = vadd.f32 %v1379_v27, %v3128_v11  ;;  %v2148_v24 = vpop.f32.mrb[11].mxu0 }
 0xab2   :  { %v1614_v24 = vld [vmem:[#allocation17 + $0x30] sm:$0xff] }
 0xab3   :  { %1460 = vadd.xlane.f32.xlu0 %v3180_v28 }
 0xab4   :  { %v1452_v29 = vpop.f32.mrb[12].mxu0 }
 0xab5   :  { %v3184_v1 = vadd.f32 %v1452_v29, %v3132_v14  ;;  %v2153_v30 = vpop.f32.mrb[13].mxu0  ;;  %v1615_v29 = vld [vmem:[#allocation17 + $0x38] sm:$0xff] }
 0xab6   :  { %v2460_v30 = vpack.c.bf16 %v1615_v29, %v1614_v24 }
 0xab7   :  { %1462 = vadd.xlane.f32.xlu1 %v3184_v1 }
 0xab8   :  { %2461 = vmatprep.subr.bf16.mxu1 %v2460_v30 }
 0xab9   :  { %2463 = vmatpush3.bf16.msra.mxu1 %v2460_v30 }
 0xaba   :  { %2465 = vmatprep.subr.bf16.mxu1 %v2464_v41 }
 0xabd   :  { %2467 = vmatpush3.bf16.msra.mxu1 %v2464_v41 }
 0xabe   :  { %2469 = vmatprep.subr.bf16.mxu1 %v2468_v35 }
 0xac1   :  { %2471 = vmatpush3.bf16.msra.mxu1 %v2468_v35 }
 0xb40   :  { %v1461_v11 = vpop.xlane.xlu0 %1460 }
 0xb41   :  { %v1464_v36 = vmul.f32 0.03125, %v1461_v11  ;;  %v1620_v11 = vld [vmem:[#allocation17 + $0x60] sm:$0xff] }
 0xb43   :  { %v1466_v37 = vsub.f32 %v3180_v28, %v1464_v36  ;;  %v1621_v36 = vld [vmem:[#allocation17 + $0x68] sm:$0xff] }
 0xb44   :  { %v1463_v38 = vpop.xlane.xlu1 %1462 }
 0xb45   :  { %v1465_v14 = vmul.f32 0.03125, %v1463_v38  ;;  %v1468_v39 = vsel %vm202_vm0, %v1466_v37, 0.0  ;;  %v2472_v37 = vpack.c.bf16 %v1621_v36, %v1620_v11  ;;  %v1622_v38 = vld [vmem:[#allocation17 + $0x70] sm:$0xff] }
 0xb46   :  { %v1470_v40 = vmul.f32 %v1468_v39, %v1468_v39 }
 0xb47   :  { %v1467_v42 = vsub.f32 %v3184_v1, %v1465_v14  ;;  %2473 = vmatprep.subr.bf16.mxu1 %v2472_v37  ;;  %v1623_v14 = vld [vmem:[#allocation17 + $0x78] sm:$0xff] }
 0xb48   :  { %1472 = vadd.xlane.f32.xlu0 %v1470_v40  ;;  %2475 = vmatpush3.bf16.msra.mxu1 %v2472_v37  ;;  %v1742_v40 = vld [vmem:[%s3237_s15] ss:$0 sm:$0xff] }
 0xb49   :  { %v1469_v43 = vsel %vm202_vm0, %v1467_v42, 0.0 }
 0xb4a   :  { %v1471_v44 = vmul.f32 %v1469_v43, %v1469_v43 }
 0xb4c   :  { %1474 = vadd.xlane.f32.xlu1 %v1471_v44 }
 0xbd5   :  { %v1473_v9 = vpop.xlane.xlu0 %1472 }
 0xbd6   :  { %v1476_v10 = vmul.f32 0.03125, %v1473_v9 }
 0xbd8   :  { %v1478_v12 = vadd.f32 1e-05, %v1476_v10 }
 0xbd9   :  { %v1475_v13 = vpop.xlane.xlu1 %1474 }
 0xbda   :  { %2519 = vrsqrt.f32 %v1478_v12  ;;  %v1477_v16 = vmul.f32 0.03125, %v1475_v13 }
 0xbdc   :  { %v1479_v17 = vadd.f32 1e-05, %v1477_v16 }
 0xbde   :  { %2521 = vrsqrt.f32 %v1479_v17 }
 0xbe4   :  { %v2520_v18 = vpop.eup %2519 }
 0xbe5   :  { %v1482_v20 = vmul.f32 %v2520_v18, %v1468_v39  ;;  %v2476_v39 = vpack.c.bf16 %v1623_v14, %v1622_v38 }
 0xbe7   :  { %v1490_v23 = vmul.f32 %v1740_v19, %v1482_v20  ;;  %2477 = vmatprep.subr.bf16.mxu1 %v2476_v39 }
 0xbe8   :  { %v2522_v25 = vpop.eup %2521  ;;  %2479 = vmatpush3.bf16.msra.mxu1 %v2476_v39 }
 0xbe9   :  { %v1483_v26 = vmul.f32 %v2522_v25, %v1469_v43  ;;  %v1498_v0 = vadd.f32 %v1741_v22, %v1490_v23 }
 0xbeb   :  { %v1491_v21 = vmul.f32 %v1740_v19, %v1483_v26  ;;  %2186 = vmatprep.mubr.f32.mxu0 %v1498_v0 }
 0xbed   :  { %v1499_v27 = vadd.f32 %v1741_v22, %v1491_v21 }
 0xbef   :  { %2187 = vmatmul.mubr.f32.vlgmr.msra.gmra.mrb[14].mxu0 %v1499_v27 }
 0xcc2   :  { %v2188_v42 = vpop.f32.mrb[14].mxu0 }
 0xcc3   :  { %v1595_v43 = vadd.f32 %v2188_v42, %v1742_v40  ;;  %v1589_v44 = vpop.f32.mrb[15].mxu0 }
 0xcc4   :  { %v1590_v45 = vadd.f32 %v1742_v40, %v1589_v44 }
 0xcc5   :  { %v1601_v46 = vmul.f32 0.70710677, %v1595_v43  ;;  %v1599_v53 = vmul.f32 0.5, %v1595_v43 }
 0xcc6   :  { %v1600_v47 = vmul.f32 0.70710677, %v1590_v45  ;;  %v1598_v51 = vmul.f32 0.5, %v1590_v45 }
 0xcc7   :  { %2523 = verf.f32 %v1601_v46 }
 0xcc8   :  { %2525 = verf.f32 %v1600_v47 }
 0xcd1   :  { %v2524_v48 = vpop.eup %2523 }
 0xcd2   :  { %v2526_v49 = vpop.eup %2525  ;;  %v1605_v50 = vadd.f32 1.0, %v2524_v48 }
 0xcd3   :  { %v1604_v52 = vadd.f32 1.0, %v2526_v49 }
 0xcd4   :  { %v1607_v55 = vmul.f32 %v1605_v50, %v1599_v53 }
 0xcd5   :  { %v1606_v54 = vmul.f32 %v1604_v52, %v1598_v51 }
 0xcd7   :  { %2221 = vmatprep.mubr.f32.mxu1 %v1606_v54 }
 0xcd8   :  { %2222 = vmatmul.mubr.f32.vlgmr.msra.gmra.mrb[14].mxu1 %v1607_v55 }
 0xdab   :  { %v2223_v15 = vpop.f32.mrb[14].mxu1 }
 0xdac   :  { %v1703_v57 = vadd.f32 %v2223_v15, %v1743_v56  ;;  %v1697_v58 = vpop.f32.mrb[15].mxu1 }
 0xdad   :  { %v1698_v59 = vadd.f32 %v1743_v56, %v1697_v58 }
 0xdae   :  { %v1707_v60 = vadd.f32 %v1703_v57, %v3184_v1 }
 0xdaf   :  { %v1706_v61 = vadd.f32 %v1698_v59, %v3180_v28 }
 0xdb0   :  { %1709 = vst [vmem:[#allocation19 + $0x8] sm:$0xff] %v1707_v60 }
 0xdb1   :  { %1708 = vst [vmem:[#allocation19] sm:$0xff] %v1706_v61 }
 0xdb2   :  { %2758 = shalt.err (!%p2755_p0)
}
 0xdb3   :  { %s3251_s2 = sld [smem:[#allocation30_spill]] }
 0xdb9   :  { %s2759_s6 = scalar_lea.hbm %s3251_s2, 256 }
 0xdba   :  { %p2760_p1 = scmp.ne.s32.totalorder %s3251_s2, %s2759_s6  ;;  %p2763_p2 = scmp.lt.u32.totalorder %s2759_s6, %s3251_s2 }
 0xdbc   :  { %p2765_p3 = pnand %p2763_p2, %p2760_p1 }
 0xdbe   :  { %2768 = shalt.err (!%p2765_p3)
}
 0xdbf   :  { %1721 = dma.vmem_to_hbm [thread:$0]  %s1716_s20, 256, %s3251_s2, [#allocation4], %s2785_s25, %s2785_s25, %s2786_s26  }
 0xdc0   :  { %2781 = dma.done.wait [#allocation4], 256  }
 0xdc1   :  { %2782 = vsyncadd [#allocation4], 4294967040 }
 0xdc2   :  { %1725 = vsyncpa [#allocation3], 1 }
 0xdc3   :  { %1726 = vsyncpa [#allocation6], 1 }
 0xdc4   :  { %1727 = vsyncpa [#allocation9], 1 }
 0xdc5   :  { %1728 = vsyncpa [#allocation12], 1 }
 0xdc6   :  { %1729 = vsyncpa [#allocation15], 1 }
 0xdc7   :  { %1730 = vsyncpa [#allocation18], 1 }
 0xdc8   :  { %1731 = vsyncpa [#allocation4], 1 }

</bundles_post_ra>
